<compile_context>
chip_gen: v7x
topology: tpu7x:2x2x1
jax: 0.10.0
libtpu: 0.0.40
codegen_flags: <defaults>
</compile_context>

<pallas_src>
import jax
import jax.numpy as jnp
from jax.experimental import pallas as pl
from jax.experimental.pallas import tpu as pltpu

# Module-consistent sizes
N_INST = 8              # instances per bag (rows of H)
C, HS, WS = 4, 16, 16   # per-instance image (NCHW like PyTorch)
F_IN = C * HS * WS      # 1024 flattened instance features
L = 512                 # self.L for model='res' (resnet18 feature dim)
D = 128                 # self.D
K = 1                   # self.K

MAX_BAGS_PER_BLOCK = 128     # 128 bags * 8 instances = 1024 MXU rows per step
OUT_LANES = 128              # lane-dense packed output row per bag


def pretr_att_kernel(x_ref, wext_ref, bext_ref, wvu_ref, bvu_ref,
                     watt_ref, batt_ref, wc_ref, bc_ref, out_ref):
    rows = x_ref.shape[0]
    bags = rows // N_INST

    # TODO(synk): torchvision resnet18 backbone (self.extractor) has no clean
    # single-kernel Pallas equivalent; replaced by one deterministic
    # Linear + ReLU projection to L=512 features per instance.
    x = x_ref[...]                                                       # (R, F_IN) bf16
    feat = jnp.dot(x, wext_ref[...],
                   preferred_element_type=jnp.float32) + bext_ref[...]   # (R, L) f32
    # Keep H only as bf16 through the attention matmuls (drops the f32 copy
    # that otherwise stays live across them — perf review item).
    Hb = jnp.maximum(feat, 0.0).astype(jnp.bfloat16)                     # (R, L) bf16

    # Fused attention_V / attention_U: one (L, 2D)=(512,256) matmul filling the
    # 256-wide MXU, split into tanh / sigmoid halves (gated attention branch).
    vu = jnp.dot(Hb, wvu_ref[...],
                 preferred_element_type=jnp.float32) + bvu_ref[...]      # (R, 2D) f32
    av = jnp.tanh(vu[:, :D])                                             # (R, D)
    au = jax.nn.sigmoid(vu[:, D:])                                       # (R, D)
    gated = av * au                                                      # (R, D)

    # attention_weights Linear(D, K=1): single-output-column matmul replaced
    # by VPU multiply + lane reduce (watt stored as a (1, D) row).
    scored = gated * watt_ref[...]                                       # (R, D)
    scores = jnp.sum(scored.reshape(bags, N_INST, D),
                     axis=-1) + batt_ref[...]                            # (bags, N)

    # per-bag softmax over the instance axis (torch: transpose then softmax(dim=1))
    m = jnp.max(scores, axis=-1, keepdims=True)
    e = jnp.exp(scores - m)
    a_soft = e / jnp.sum(e, axis=-1, keepdims=True)                      # (bags, N)

    # M = A @ H per bag (K == 1): weight instance rows then segment-sum.
    H3 = Hb.reshape(bags, N_INST, L).astype(jnp.float32)
    M = jnp.sum(H3 * a_soft[:, :, None], axis=1)                         # (bags, L)

    # classifier Linear(L*K, 1) + Sigmoid, again as VPU multiply + lane reduce.
    logit = jnp.sum(M * wc_ref[...], axis=-1, keepdims=True) + bc_ref[...]   # (bags, 1)
    y_prob = jax.nn.sigmoid(logit)

    # Lane-dense packed output: lanes [0, N_INST) = softmaxed attention,
    # lane N_INST = Y_prob, remaining lanes zero. One unmasked (bags, 128) store.
    pad = jnp.zeros((bags, OUT_LANES - N_INST - 1), jnp.float32)
    out_ref[...] = jnp.concatenate([a_soft, y_prob, pad], axis=-1)


def _linear_params(key, fan_in, fan_out):
    """PyTorch nn.Linear default init (uniform +-1/sqrt(fan_in)); weight stored
    pre-transposed as (fan_in, fan_out) so the kernel computes x @ W + b."""
    kw, kb = jax.random.split(key)
    bound = float(fan_in) ** -0.5
    w = jax.random.uniform(kw, (fan_in, fan_out), jnp.float32, -bound, bound)
    b = jax.random.uniform(kb, (1, fan_out), jnp.float32, -bound, bound)
    return w, b


def init_params(key):
    keys = jax.random.split(key, 5)
    wext, bext = _linear_params(keys[0], F_IN, L)     # extractor stand-in
    wv, bv = _linear_params(keys[1], L, D)            # attention_V Linear(L, D)
    wu, bu = _linear_params(keys[2], L, D)            # attention_U Linear(L, D)
    watt, batt = _linear_params(keys[3], D, K)        # attention_weights Linear(D, K)
    wc, bc = _linear_params(keys[4], L * K, 1)        # classifier Linear(L*K, 1)
    # Fuse V/U into a single (L, 2D) weight / (1, 2D) bias (perf review item).
    wvu = jnp.concatenate([wv, wu], axis=1)
    bvu = jnp.concatenate([bv, bu], axis=1)
    return dict(
        # big matmul weights in bf16 (MXU inputs, f32 accumulation in-kernel)
        wext=wext.astype(jnp.bfloat16), bext=bext,
        wvu=wvu.astype(jnp.bfloat16), bvu=bvu,
        # K == 1 heads stored as dense rows for the VPU multiply + lane reduce
        watt=jnp.transpose(watt), batt=batt,          # (1, D), (1, 1)
        wc=jnp.transpose(wc), bc=bc,                  # (1, L), (1, 1)
    )


def _choose_bags_per_block(num_bags, max_bags=MAX_BAGS_PER_BLOCK):
    """Adaptive block size: big blocks amortize the ~0.35us per-step overhead;
    >= 2 (even) grid steps keep both v7x TensorCores busy; tiny batches avoid
    padding up to a huge block.  Always a multiple of 8 bags (= 64 rows) so
    bf16 (16,128) and f32 (8,128) tiling constraints hold for partial grids."""
    if num_bags <= 8:
        return 8                                       # latency path: one small block
    n_steps = max(2, pl.cdiv(num_bags, max_bags))      # >= 2 steps for megacore
    if n_steps % 2:
        n_steps += 1                                   # even steps -> balanced TCs
    bpb = ((pl.cdiv(num_bags, n_steps) + 7) // 8) * 8
    return min(max_bags, bpb)


def _spec(shape, index_map, buffers=None):
    """BlockSpec with optional explicit buffer count (falls back gracefully if
    this jax version's BlockSpec has no pipeline_mode kwarg)."""
    if buffers is not None:
        try:
            return pl.BlockSpec(shape, index_map, pipeline_mode=pl.Buffered(buffers))
        except TypeError:
            pass
    return pl.BlockSpec(shape, index_map)


def pretr_att_forward(x_bags, params):
    """x_bags: (B, N, C, H, W) stack of bags (B == 1 matches the PyTorch module's
    single-bag input after x.squeeze(0)).
    Returns (Y_prob (B,1), Y_hat (B,1), A (B, K, N))."""
    B, n = x_bags.shape[0], x_bags.shape[1]
    assert n == N_INST and x_bags.shape[2:] == (C, HS, WS)

    # NCHW -> (B*N, C*H*W) reshape + bf16 cast once for the whole batch.
    x_flat = x_bags.reshape(B * n, F_IN).astype(jnp.bfloat16)

    bags_per_block = _choose_bags_per_block(B)
    rows_per_block = bags_per_block * N_INST
    num_blocks = pl.cdiv(B, bags_per_block)
    Bp = num_blocks * bags_per_block
    if Bp != B:                                       # pad bag count to a full block
        x_flat = jnp.pad(x_flat, ((0, (Bp - B) * n), (0, 0)))

    def resident(shape):                              # weight stays in VMEM all grid steps
        # constant index_map + single buffer: DMA'd once, no second pipeline buffer
        return _spec(shape, lambda i: (0,) * len(shape), buffers=1)

    # Advisory cost so XLA overlaps the surrounding reshape/pad/slice with the call.
    r_tot = Bp * N_INST
    cost = pl.CostEstimate(
        flops=2 * r_tot * F_IN * L + 2 * r_tot * L * (2 * D) + 2 * r_tot * L,
        transcendentals=r_tot * 2 * D + r_tot + Bp,
        bytes_accessed=(r_tot * F_IN * 2                       # bf16 x
                        + (F_IN * L + L * 2 * D) * 2           # bf16 weights
                        + (L + 2 * D + D + 1 + L + 1) * 4      # f32 biases / heads
                        + Bp * OUT_LANES * 4),                 # packed output
    )

    packed = pl.pallas_call(
        pretr_att_kernel,
        out_shape=jax.ShapeDtypeStruct((Bp, OUT_LANES), jnp.float32),
        grid=(num_blocks,),
        in_specs=[
            # x rows advance with the grid; default double-buffered.
            # (v6e-only option: pipeline_mode=pl.Buffered(3) here absorbs HBM jitter.)
            pl.BlockSpec((rows_per_block, F_IN), lambda i: (i, 0)),
            resident((F_IN, L)), resident((1, L)),             # wext, bext
            resident((L, 2 * D)), resident((1, 2 * D)),        # wvu, bvu (fused V/U)
            resident((1, D)), resident((1, 1)),                # watt, batt
            resident((1, L)), resident((1, 1)),                # wc, bc
        ],
        out_specs=pl.BlockSpec((bags_per_block, OUT_LANES), lambda i: (i, 0)),
        compiler_params=pltpu.CompilerParams(
            dimension_semantics=("parallel",),        # bag axis -> both TCs on v7x
            vmem_limit_bytes=48 * 1024 * 1024),       # 128-bag block > v5e 16 MiB default
        cost_estimate=cost,
    )(x_flat,
      params["wext"], params["bext"],
      params["wvu"], params["bvu"],
      params["watt"], params["batt"],
      params["wc"], params["bc"])

    a = packed[:B, :N_INST]                           # (B, N) softmaxed attention
    y_prob = packed[:B, N_INST:N_INST + 1]            # (B, 1)
    y_hat = (y_prob >= 0.5).astype(jnp.float32)       # torch.ge(Y_prob, 0.5).float()
    A = a[:, None, :]                                 # per-bag (K, N), i.e. transpose(A,1,0)
    return y_prob, y_hat, A


if __name__ == "__main__":
    key = jax.random.PRNGKey(0)
    kx, kp = jax.random.split(key)
    params = init_params(kp)
    fwd = jax.jit(pretr_att_forward)

    # 1) Native single-bag call of the PyTorch module (B == 1 after x.squeeze(0)):
    #    exercises the small-block latency path.
    x1 = jax.random.normal(kx, (1, N_INST, C, HS, WS), dtype=jnp.float32)
    y_prob1, y_hat1, A1 = jax.block_until_ready(fwd(x1, params))
    assert y_prob1.shape == (1, 1)
    assert y_hat1.shape == (1, 1)
    assert A1.shape == (1, K, N_INST)
    assert bool(jnp.all((y_prob1 > 0.0) & (y_prob1 < 1.0)))
    assert bool(jnp.all(jnp.abs(jnp.sum(A1, axis=-1) - 1.0) < 1e-4))

    # 2) Batched multi-block path (exercises the parallel grid over bags).
    NUM_BAGS = 64
    xb = jax.random.normal(kx, (NUM_BAGS, N_INST, C, HS, WS), dtype=jnp.float32)
    y_prob, y_hat, A = jax.block_until_ready(fwd(xb, params))
    assert y_prob.shape == (NUM_BAGS, 1)
    assert y_hat.shape == (NUM_BAGS, 1)
    assert A.shape == (NUM_BAGS, K, N_INST)
    assert bool(jnp.all((y_prob > 0.0) & (y_prob < 1.0)))
    assert bool(jnp.all(jnp.abs(jnp.sum(A, axis=-1) - 1.0) < 1e-4))
    assert bool(jnp.all((y_hat == 0.0) | (y_hat == 1.0)))

    print("KERNEL_OK")
</pallas_src>

<mosaic_0001>
module attributes {stable_mosaic.version = 11 : i64} {
  func.func @pretr_att_kernel(%arg0: i32, %arg1: memref<64x1024xbf16, #tpu.memory_space<vmem>>, %arg2: memref<1024x512xbf16, #tpu.memory_space<vmem>>, %arg3: memref<1x512xf32, #tpu.memory_space<vmem>>, %arg4: memref<512x256xbf16, #tpu.memory_space<vmem>>, %arg5: memref<1x256xf32, #tpu.memory_space<vmem>>, %arg6: memref<1x128xf32, #tpu.memory_space<vmem>>, %arg7: memref<1x1xf32, #tpu.memory_space<vmem>>, %arg8: memref<1x512xf32, #tpu.memory_space<vmem>>, %arg9: memref<1x1xf32, #tpu.memory_space<vmem>>, %arg10: memref<8x128xf32, #tpu.memory_space<vmem>>) attributes {dimension_semantics = [#tpu.dimension_semantics<parallel>], iteration_bounds = array<i64: 1>, scalar_prefetch = 0 : i64, scratch_operands = 0 : i64, tpu.core_type = #tpu.core_type<tc>, window_params = [{transform_indices = @transform_0, window_bounds = array<i64: 64, 1024>}, {pipeline_mode = #tpu.pipeline_mode<synchronous>, transform_indices = @transform_1, window_bounds = array<i64: 1024, 512>}, {pipeline_mode = #tpu.pipeline_mode<synchronous>, transform_indices = @transform_2, window_bounds = array<i64: 1, 512>}, {pipeline_mode = #tpu.pipeline_mode<synchronous>, transform_indices = @transform_3, window_bounds = array<i64: 512, 256>}, {pipeline_mode = #tpu.pipeline_mode<synchronous>, transform_indices = @transform_4, window_bounds = array<i64: 1, 256>}, {pipeline_mode = #tpu.pipeline_mode<synchronous>, transform_indices = @transform_5, window_bounds = array<i64: 1, 128>}, {pipeline_mode = #tpu.pipeline_mode<synchronous>, transform_indices = @transform_6, window_bounds = array<i64: 1, 1>}, {pipeline_mode = #tpu.pipeline_mode<synchronous>, transform_indices = @transform_7, window_bounds = array<i64: 1, 512>}, {pipeline_mode = #tpu.pipeline_mode<synchronous>, transform_indices = @transform_8, window_bounds = array<i64: 1, 1>}, {transform_indices = @transform_9, window_bounds = array<i64: 8, 128>}]} {
    %c0 = arith.constant 0 : index
    %c0_0 = arith.constant 0 : index
    %0 = vector.load %arg1[%c0, %c0_0] : memref<64x1024xbf16, #tpu.memory_space<vmem>>, vector<64x1024xbf16>
    %c0_1 = arith.constant 0 : index
    %c0_2 = arith.constant 0 : index
    %1 = vector.load %arg2[%c0_1, %c0_2] : memref<1024x512xbf16, #tpu.memory_space<vmem>>, vector<1024x512xbf16>
    %cst = arith.constant dense<0.000000e+00> : vector<64x512xf32>
    %2 = tpu.matmul %0, %1, %cst {dimension_numbers = #tpu.dot_dimension_numbers<[1], [0], [0], [1], [0, 0, 1, 1], [], []>} : vector<64x1024xbf16>, vector<1024x512xbf16>, vector<64x512xf32> -> vector<64x512xf32>
    %c0_3 = arith.constant 0 : index
    %c0_4 = arith.constant 0 : index
    %3 = vector.load %arg3[%c0_3, %c0_4] : memref<1x512xf32, #tpu.memory_space<vmem>>, vector<1x512xf32>
    %4 = vector.broadcast %3 : vector<1x512xf32> to vector<64x512xf32>
    %5 = arith.addf %2, %4 : vector<64x512xf32>
    %cst_5 = arith.constant 0.000000e+00 : f32
    %6 = vector.broadcast %cst_5 : f32 to vector<64x512xf32>
    %7 = arith.maximumf %5, %6 : vector<64x512xf32>
    %8 = arith.truncf %7 : vector<64x512xf32> to vector<64x512xbf16>
    %c0_6 = arith.constant 0 : index
    %c0_7 = arith.constant 0 : index
    %9 = vector.load %arg4[%c0_6, %c0_7] : memref<512x256xbf16, #tpu.memory_space<vmem>>, vector<512x256xbf16>
    %cst_8 = arith.constant dense<0.000000e+00> : vector<64x256xf32>
    %10 = tpu.matmul %8, %9, %cst_8 {dimension_numbers = #tpu.dot_dimension_numbers<[1], [0], [0], [1], [0, 0, 1, 1], [], []>} : vector<64x512xbf16>, vector<512x256xbf16>, vector<64x256xf32> -> vector<64x256xf32>
    %c0_9 = arith.constant 0 : index
    %c0_10 = arith.constant 0 : index
    %11 = vector.load %arg5[%c0_9, %c0_10] : memref<1x256xf32, #tpu.memory_space<vmem>>, vector<1x256xf32>
    %12 = vector.broadcast %11 : vector<1x256xf32> to vector<64x256xf32>
    %13 = arith.addf %10, %12 : vector<64x256xf32>
    %14 = vector.extract_strided_slice %13 {offsets = [0, 0], sizes = [64, 128], strides = [1, 1]} : vector<64x256xf32> to vector<64x128xf32>
    %15 = math.tanh %14 : vector<64x128xf32>
    %16 = vector.extract_strided_slice %13 {offsets = [0, 128], sizes = [64, 128], strides = [1, 1]} : vector<64x256xf32> to vector<64x128xf32>
    %17 = arith.negf %16 : vector<64x128xf32>
    %18 = math.exp %17 : vector<64x128xf32>
    %cst_11 = arith.constant 1.000000e+00 : f32
    %19 = vector.broadcast %cst_11 : f32 to vector<64x128xf32>
    %20 = arith.addf %19, %18 : vector<64x128xf32>
    %21 = arith.divf %19, %20 : vector<64x128xf32>
    %22 = arith.mulf %15, %21 : vector<64x128xf32>
    %c0_12 = arith.constant 0 : index
    %c0_13 = arith.constant 0 : index
    %23 = vector.load %arg6[%c0_12, %c0_13] : memref<1x128xf32, #tpu.memory_space<vmem>>, vector<1x128xf32>
    %24 = vector.broadcast %23 : vector<1x128xf32> to vector<64x128xf32>
    %25 = arith.mulf %22, %24 : vector<64x128xf32>
    %26 = vector.shape_cast %25 : vector<64x128xf32> to vector<8x8x128xf32>
    %cst_14 = arith.constant dense<0.000000e+00> : vector<8x8xf32>
    %27 = vector.multi_reduction <add>, %26, %cst_14 [2] : vector<8x8x128xf32> to vector<8x8xf32>
    %c0_15 = arith.constant 0 : index
    %c0_16 = arith.constant 0 : index
    %28 = vector.load %arg7[%c0_15, %c0_16] : memref<1x1xf32, #tpu.memory_space<vmem>>, vector<1x1xf32>
    %29 = vector.broadcast %28 : vector<1x1xf32> to vector<8x8xf32>
    %30 = arith.addf %27, %29 : vector<8x8xf32>
    %cst_17 = arith.constant dense<0xFF800000> : vector<8xf32>
    %31 = vector.multi_reduction <maximumf>, %30, %cst_17 [1] : vector<8x8xf32> to vector<8xf32>
    %32 = vector.shape_cast %31 : vector<8xf32> to vector<8x1xf32>
    %33 = vector.broadcast %32 : vector<8x1xf32> to vector<8x8xf32>
    %34 = arith.subf %30, %33 : vector<8x8xf32>
    %35 = math.exp %34 : vector<8x8xf32>
    %cst_18 = arith.constant dense<0.000000e+00> : vector<8xf32>
    %36 = vector.multi_reduction <add>, %35, %cst_18 [1] : vector<8x8xf32> to vector<8xf32>
    %37 = vector.shape_cast %36 : vector<8xf32> to vector<8x1xf32>
    %38 = vector.broadcast %37 : vector<8x1xf32> to vector<8x8xf32>
    %39 = arith.divf %35, %38 : vector<8x8xf32>
    %40 = vector.shape_cast %8 : vector<64x512xbf16> to vector<8x8x512xbf16>
    %41 = arith.extf %40 : vector<8x8x512xbf16> to vector<8x8x512xf32>
    %42 = vector.shape_cast %39 : vector<8x8xf32> to vector<8x8x1xf32>
    %43 = vector.broadcast %42 : vector<8x8x1xf32> to vector<8x8x512xf32>
    %44 = arith.mulf %41, %43 : vector<8x8x512xf32>
    %cst_19 = arith.constant dense<0.000000e+00> : vector<8x512xf32>
    %45 = vector.multi_reduction <add>, %44, %cst_19 [1] : vector<8x8x512xf32> to vector<8x512xf32>
    %c0_20 = arith.constant 0 : index
    %c0_21 = arith.constant 0 : index
    %46 = vector.load %arg8[%c0_20, %c0_21] : memref<1x512xf32, #tpu.memory_space<vmem>>, vector<1x512xf32>
    %47 = vector.broadcast %46 : vector<1x512xf32> to vector<8x512xf32>
    %48 = arith.mulf %45, %47 : vector<8x512xf32>
    %cst_22 = arith.constant dense<0.000000e+00> : vector<8xf32>
    %49 = vector.multi_reduction <add>, %48, %cst_22 [1] : vector<8x512xf32> to vector<8xf32>
    %50 = vector.shape_cast %49 : vector<8xf32> to vector<8x1xf32>
    %c0_23 = arith.constant 0 : index
    %c0_24 = arith.constant 0 : index
    %51 = vector.load %arg9[%c0_23, %c0_24] : memref<1x1xf32, #tpu.memory_space<vmem>>, vector<1x1xf32>
    %52 = vector.broadcast %51 : vector<1x1xf32> to vector<8x1xf32>
    %53 = arith.addf %50, %52 : vector<8x1xf32>
    %54 = arith.negf %53 : vector<8x1xf32>
    %55 = math.exp %54 : vector<8x1xf32>
    %cst_25 = arith.constant 1.000000e+00 : f32
    %56 = vector.broadcast %cst_25 : f32 to vector<8x1xf32>
    %57 = arith.addf %56, %55 : vector<8x1xf32>
    %58 = arith.divf %56, %57 : vector<8x1xf32>
    %cst_26 = arith.constant 0.000000e+00 : f32
    %59 = vector.broadcast %cst_26 : f32 to vector<8x119xf32>
    %60 = tpu.concatenate %39, %58, %59 in 1 : vector<8x8xf32>, vector<8x1xf32>, vector<8x119xf32> -> vector<8x128xf32>
    %c0_27 = arith.constant 0 : index
    %c0_28 = arith.constant 0 : index
    %61 = vector.load %arg10[%c0_27, %c0_28] : memref<8x128xf32, #tpu.memory_space<vmem>>, vector<8x128xf32>
    tpu.vector_store %arg10[%c0_27, %c0_28], %60 {strides = array<i32>} : memref<8x128xf32, #tpu.memory_space<vmem>>, vector<8x128xf32>,
    return
  }
  func.func @transform_0(%arg0: i32) -> (i32, i32) {
    %c0_i32 = arith.constant 0 : i32
    %c0_i32_0 = arith.constant 0 : i32
    return %arg0, %c0_i32 : i32, i32
  }
  func.func @transform_1(%arg0: i32) -> (i32, i32) {
    %c0_i32 = arith.constant 0 : i32
    %c0_i32_0 = arith.constant 0 : i32
    %c0_i32_1 = arith.constant 0 : i32
    return %c0_i32, %c0_i32_0 : i32, i32
  }
  func.func @transform_2(%arg0: i32) -> (i32, i32) {
    %c0_i32 = arith.constant 0 : i32
    %c0_i32_0 = arith.constant 0 : i32
    %c0_i32_1 = arith.constant 0 : i32
    return %c0_i32, %c0_i32_0 : i32, i32
  }
  func.func @transform_3(%arg0: i32) -> (i32, i32) {
    %c0_i32 = arith.constant 0 : i32
    %c0_i32_0 = arith.constant 0 : i32
    %c0_i32_1 = arith.constant 0 : i32
    return %c0_i32, %c0_i32_0 : i32, i32
  }
  func.func @transform_4(%arg0: i32) -> (i32, i32) {
    %c0_i32 = arith.constant 0 : i32
    %c0_i32_0 = arith.constant 0 : i32
    %c0_i32_1 = arith.constant 0 : i32
    return %c0_i32, %c0_i32_0 : i32, i32
  }
  func.func @transform_5(%arg0: i32) -> (i32, i32) {
    %c0_i32 = arith.constant 0 : i32
    %c0_i32_0 = arith.constant 0 : i32
    %c0_i32_1 = arith.constant 0 : i32
    return %c0_i32, %c0_i32_0 : i32, i32
  }
  func.func @transform_6(%arg0: i32) -> (i32, i32) {
    %c0_i32 = arith.constant 0 : i32
    %c0_i32_0 = arith.constant 0 : i32
    %c0_i32_1 = arith.constant 0 : i32
    return %c0_i32, %c0_i32_0 : i32, i32
  }
  func.func @transform_7(%arg0: i32) -> (i32, i32) {
    %c0_i32 = arith.constant 0 : i32
    %c0_i32_0 = arith.constant 0 : i32
    %c0_i32_1 = arith.constant 0 : i32
    return %c0_i32, %c0_i32_0 : i32, i32
  }
  func.func @transform_8(%arg0: i32) -> (i32, i32) {
    %c0_i32 = arith.constant 0 : i32
    %c0_i32_0 = arith.constant 0 : i32
    %c0_i32_1 = arith.constant 0 : i32
    return %c0_i32, %c0_i32_0 : i32, i32
  }
  func.func @transform_9(%arg0: i32) -> (i32, i32) {
    %c0_i32 = arith.constant 0 : i32
    %c0_i32_0 = arith.constant 0 : i32
    return %arg0, %c0_i32 : i32, i32
  }
}

</mosaic_0001>

<bundles_post_ra>
// kernel: pretr_att_forward.1
= control target key start
LH: loop header
LB: loop body
LE: loop exit
PB: predicated region body
PF: predicated region fallthrough
CT: control target
= control target key end

     0   :  { %s6162_s0 = inlined_call_operand.vmem [shape: bf16[64,1024], index: 0, kind: input, shape index: {}]   ;;  %s6163_s1 = inlined_call_operand.hbm [shape: bf16[1024,512], index: 1, kind: input, shape index: {}]   ;;  %s6164_s2 = inlined_call_operand.vmem [shape: f32[1,512], index: 2, kind: input, shape index: {}]   ;;  %s6165_s3 = inlined_call_operand.vmem [shape: bf16[512,256], index: 3, kind: input, shape index: {}]   ;;  %s6166_s4 = inlined_call_operand.vmem [shape: f32[1,256], index: 4, kind: input, shape index: {}]   ;;  %s6167_s5 = inlined_call_operand.vmem [shape: f32[1,128], index: 5, kind: input, shape index: {}]   ;;  %s6168_s6 = inlined_call_operand.<no memory space> [shape: f32[1,1], index: 6, kind: input, shape index: {}]   ;;  %s6169_s7 = inlined_call_operand.vmem [shape: f32[1,512], index: 7, kind: input, shape index: {}]   ;;  %s6170_s9 = inlined_call_operand.vmem [shape: f32[8,128], index: 9, kind: output, shape index: {}]   ;;  %s6171_s8 = inlined_call_operand.<no memory space> [shape: f32[1,1], index: 8, kind: input, shape index: {}]  }
   0x1   :  { %v14_v0 = vstv %s6168_s6  ;;  %v16_v1 = vstv %s6171_s8 }
   0x2   :  { %15 = vst [vmem:[#allocation2] sm:$0x1] %v14_v0  ;;  %17 = vst [vmem:[#allocation3] sm:$0x1] %v16_v1 }
   0x3   :  { %18 = vsyncpa [#allocation5], 0  ;;  %s5090_s13 = smov [#allocation4]   ;;  %s5066_s17 = scalar_lea.hbm %s6163_s1, 32768 }
   0x4   :  { %s26_s14 = sshll.u32 %s5090_s13, 4  ;;  %p5067_p0 = scmp.ne.s32.totalorder %s6163_s1, %s5066_s17  ;;  %s27_s14 = int_to_ptr.vmem [resolvable:$true] %s26_s14 }
   0x5   :  { %p5070_p1 = scmp.lt.u32.totalorder %s5066_s17, %s6163_s1 }
   0x7   :  { %p5072_p2 = pnand %p5070_p1, %p5067_p0 }
   0x9   :  { %5075 = shalt.err (!%p5072_p2)
}
   0xa   :  { %s5076_s8 = scalar_lea.vmem %s27_s14, 32768  ;;  %p5081_p4 = scmp.lt.s32.totalorder %s27_s14, %s27_s14 }
   0xb   :  { %p5077_p3 = scmp.ne.s32.totalorder %s27_s14, %s5076_s8  ;;  %p5082_p5 = scmp.lt.s32.totalorder %s5076_s8, %s5076_s8 }
   0xd   :  { %p5083_p6 = por %p5082_p5, %p5081_p4 }
   0xf   :  { %p5084_p7 = pnand %p5083_p6, %p5077_p3 }
  0x11   :  { %5087 = shalt.err (!%p5084_p7)
}
  0x12   :  { %s5091_s21 = smov 256   ;;  %s5092_s22 = smov 16  }
  0x13   :  { %32 = dma.hbm_to_vmem [thread:$0]  %s6163_s1, 32768, %s27_s14, [#allocation5], %s5091_s21, %s5091_s21, %s5092_s22  }
  0x14   :  { %5088 = dma.done.wait [#allocation5], 32768  }
  0x15   :  { %5089 = vsyncadd [#allocation5], 4294934528  ;;  %v4502_v2 = vld [vmem:[#allocation4 + $0x4] ss:$16 sps:$4 sm:$0xff]   ;;  %v4506_v4 = vld [vmem:[#allocation4] ss:$16 sps:$4 sm:$0xff]  }
  0x16   :  { %v4504_v3 = vld [vmem:[#allocation4 + $0x204] ss:$16 sps:$4 sm:$0xff]   ;;  %1800 = vmatprep.subr.bf16.mxu1 %v4502_v2  ;;  %v4507_v5 = vld [vmem:[#allocation4 + $0x200] ss:$16 sps:$4 sm:$0xff]   ;;  %vm3129_vm0 = vcmask 1041409   ;;  %vm3131_vm1 = vcmask 1042434  }
  0x17   :  { %1873 = vmatprep.subr.bf16.mxu0 %v4504_v3  ;;  %v4508_v6 = vld [vmem:[#allocation4 + $0x24] ss:$16 sps:$4 sm:$0xff]   ;;  %1801 = vmatpush1.bf16.msra.mxu1 %v4506_v4  ;;  %v4512_v8 = vld [vmem:[#allocation4 + $0x20] ss:$16 sps:$4 sm:$0xff]   ;;  %vm3133_vm2 = vcmask 1043459   ;;  %vm3135_vm3 = vcmask 1044484  }
  0x18   :  { %1874 = vmatpush1.bf16.msra.mxu0 %v4507_v5  ;;  %v4510_v7 = vld [vmem:[#allocation4 + $0x224] ss:$16 sps:$4 sm:$0xff]   ;;  %1802 = vmatprep.subr.bf16.mxu1 %v4508_v6  ;;  %v4513_v9 = vld [vmem:[#allocation4 + $0x220] ss:$16 sps:$4 sm:$0xff]   ;;  %vm3137_vm4 = vcmask 1045509   ;;  %vm3139_vm5 = vcmask 1046534  }
  0x19   :  { %1875 = vmatprep.subr.bf16.mxu0 %v4510_v7  ;;  %v4514_v10 = vld [vmem:[#allocation4 + $0x44] ss:$16 sps:$4 sm:$0xff]   ;;  %v4518_v12 = vld [vmem:[#allocation4 + $0x40] ss:$16 sps:$4 sm:$0xff]   ;;  %vm3141_vm6 = vcmask 1047559   ;;  %vm3144_vm7 = vcmask 64512  }
  0x1a   :  { %v4516_v11 = vld [vmem:[#allocation4 + $0x244] ss:$16 sps:$4 sm:$0xff]   ;;  %v4519_v13 = vld [vmem:[#allocation4 + $0x240] ss:$16 sps:$4 sm:$0xff]   ;;  %vm3931_vm8 = vcmask 72704  }
  0x1b   :  { %1803 = vmatpush1.bf16.msra.mxu1 %v4512_v8  ;;  %v4520_v14 = vld [vmem:[#allocation4 + $0x64] ss:$16 sps:$4 sm:$0xff]   ;;  %v4524_v16 = vld [vmem:[#allocation4 + $0x60] ss:$16 sps:$4 sm:$0xff]  }
  0x1c   :  { %1876 = vmatpush1.bf16.msra.mxu0 %v4513_v9  ;;  %1804 = vmatprep.subr.bf16.mxu1 %v4514_v10  ;;  %v4522_v15 = vld [vmem:[#allocation4 + $0x264] ss:$16 sps:$4 sm:$0xff]   ;;  %v4525_v17 = vld [vmem:[#allocation4 + $0x260] ss:$16 sps:$4 sm:$0xff]   ;;  %v4603_v9 = vld [vmem:[#allocation4 + $0xc] ss:$16 sps:$4 sm:$0xff]  }
  0x1d   :  { %1877 = vmatprep.subr.bf16.mxu0 %v4516_v11  ;;  %v4526_v18 = vld [vmem:[#allocation4 + $0x84] ss:$16 sps:$4 sm:$0xff]   ;;  %v4530_v20 = vld [vmem:[#allocation4 + $0x80] ss:$16 sps:$4 sm:$0xff]  }
  0x1e   :  { %v4528_v19 = vld [vmem:[#allocation4 + $0x284] ss:$16 sps:$4 sm:$0xff]   ;;  %v4531_v21 = vld [vmem:[#allocation4 + $0x280] ss:$16 sps:$4 sm:$0xff]  }
  0x1f   :  { %1805 = vmatpush1.bf16.msra.mxu1 %v4518_v12  ;;  %v4532_v22 = vld [vmem:[#allocation4 + $0xa4] ss:$16 sps:$4 sm:$0xff]   ;;  %v4536_v24 = vld [vmem:[#allocation4 + $0xa0] ss:$16 sps:$4 sm:$0xff]  }
  0x20   :  { %1878 = vmatpush1.bf16.msra.mxu0 %v4519_v13  ;;  %1806 = vmatprep.subr.bf16.mxu1 %v4520_v14  ;;  %v4534_v23 = vld [vmem:[#allocation4 + $0x2a4] ss:$16 sps:$4 sm:$0xff]   ;;  %v4537_v25 = vld [vmem:[#allocation4 + $0x2a0] ss:$16 sps:$4 sm:$0xff]   ;;  %v4601_v13 = vld [vmem:[#allocation4 + $0x8] ss:$16 sps:$4 sm:$0xff]  }
  0x21   :  { %1879 = vmatprep.subr.bf16.mxu0 %v4522_v15  ;;  %v4538_v26 = vld [vmem:[#allocation4 + $0xc4] ss:$16 sps:$4 sm:$0xff]   ;;  %v4542_v28 = vld [vmem:[#allocation4 + $0xc0] ss:$16 sps:$4 sm:$0xff]   ;;  %v4609_v15 = vld [vmem:[#allocation4 + $0x2c] ss:$16 sps:$4 sm:$0xff]  }
  0x22   :  { %v4540_v27 = vld [vmem:[#allocation4 + $0x2c4] ss:$16 sps:$4 sm:$0xff]   ;;  %v4543_v29 = vld [vmem:[#allocation4 + $0x2c0] ss:$16 sps:$4 sm:$0xff]  }
  0x23   :  { %1807 = vmatpush1.bf16.msra.mxu1 %v4524_v16  ;;  %v4544_v30 = vld [vmem:[#allocation4 + $0xe4] ss:$16 sps:$4 sm:$0xff]   ;;  %v4548_v32 = vld [vmem:[#allocation4 + $0xe0] ss:$16 sps:$4 sm:$0xff]  }
  0x24   :  { %1880 = vmatpush1.bf16.msra.mxu0 %v4525_v17  ;;  %1808 = vmatprep.subr.bf16.mxu1 %v4526_v18  ;;  %v4546_v31 = vld [vmem:[#allocation4 + $0x2e4] ss:$16 sps:$4 sm:$0xff]   ;;  %v4549_v33 = vld [vmem:[#allocation4 + $0x2e0] ss:$16 sps:$4 sm:$0xff]   ;;  %v4607_v17 = vld [vmem:[#allocation4 + $0x28] ss:$16 sps:$4 sm:$0xff]  }
  0x25   :  { %1881 = vmatprep.subr.bf16.mxu0 %v4528_v19  ;;  %v4550_v34 = vld [vmem:[#allocation4 + $0x104] ss:$16 sps:$4 sm:$0xff]   ;;  %v4554_v36 = vld [vmem:[#allocation4 + $0x100] ss:$16 sps:$4 sm:$0xff]   ;;  %v4615_v19 = vld [vmem:[#allocation4 + $0x4c] ss:$16 sps:$4 sm:$0xff]  }
  0x26   :  { %v4552_v35 = vld [vmem:[#allocation4 + $0x304] ss:$16 sps:$4 sm:$0xff]   ;;  %v4555_v37 = vld [vmem:[#allocation4 + $0x300] ss:$16 sps:$4 sm:$0xff]  }
  0x27   :  { %1809 = vmatpush1.bf16.msra.mxu1 %v4530_v20  ;;  %v4556_v38 = vld [vmem:[#allocation4 + $0x124] ss:$16 sps:$4 sm:$0xff]   ;;  %v4560_v40 = vld [vmem:[#allocation4 + $0x120] ss:$16 sps:$4 sm:$0xff]  }
  0x28   :  { %1882 = vmatpush1.bf16.msra.mxu0 %v4531_v21  ;;  %1810 = vmatprep.subr.bf16.mxu1 %v4532_v22  ;;  %v4558_v39 = vld [vmem:[#allocation4 + $0x324] ss:$16 sps:$4 sm:$0xff]   ;;  %v4561_v41 = vld [vmem:[#allocation4 + $0x320] ss:$16 sps:$4 sm:$0xff]   ;;  %v4613_v21 = vld [vmem:[#allocation4 + $0x48] ss:$16 sps:$4 sm:$0xff]  }
  0x29   :  { %1883 = vmatprep.subr.bf16.mxu0 %v4534_v23  ;;  %v4562_v42 = vld [vmem:[#allocation4 + $0x144] ss:$16 sps:$4 sm:$0xff]   ;;  %v4566_v44 = vld [vmem:[#allocation4 + $0x140] ss:$16 sps:$4 sm:$0xff]  }
  0x2a   :  { %v4564_v43 = vld [vmem:[#allocation4 + $0x344] ss:$16 sps:$4 sm:$0xff]   ;;  %v4567_v45 = vld [vmem:[#allocation4 + $0x340] ss:$16 sps:$4 sm:$0xff]  }
  0x2b   :  { %1811 = vmatpush1.bf16.msra.mxu1 %v4536_v24  ;;  %v4568_v46 = vld [vmem:[#allocation4 + $0x164] ss:$16 sps:$4 sm:$0xff]   ;;  %v4572_v48 = vld [vmem:[#allocation4 + $0x160] ss:$16 sps:$4 sm:$0xff]  }
  0x2c   :  { %1884 = vmatpush1.bf16.msra.mxu0 %v4537_v25  ;;  %1812 = vmatprep.subr.bf16.mxu1 %v4538_v26  ;;  %v4570_v47 = vld [vmem:[#allocation4 + $0x364] ss:$16 sps:$4 sm:$0xff]   ;;  %v4573_v49 = vld [vmem:[#allocation4 + $0x360] ss:$16 sps:$4 sm:$0xff]  }
  0x2d   :  { %1885 = vmatprep.subr.bf16.mxu0 %v4540_v27  ;;  %v50_v50 = vld [vmem:[%s6162_s0] sm:$0xff]  ;;  %v51_v52 = vld [vmem:[%s6162_s0 + $0x8] sm:$0xff] }
  0x2e   :  { %v54_v51 = vld [vmem:[%s6162_s0 + $0x20] sm:$0xff]  ;;  %v55_v53 = vld [vmem:[%s6162_s0 + $0x28] sm:$0xff] }
  0x2f   :  { %1813 = vmatpush1.bf16.msra.mxu1 %v4542_v28  ;;  %v4574_v54 = vld [vmem:[#allocation4 + $0x184] ss:$16 sps:$4 sm:$0xff]   ;;  %v5175_v55 = vcombine.high %v50_v50, %v54_v51  ;;  %v5177_v57 = vcombine.high %v51_v52, %v55_v53  ;;  %v4578_v58 = vld [vmem:[#allocation4 + $0x180] ss:$16 sps:$4 sm:$0xff]   ;;  %v5181_v10 = vcombine.low %v50_v50, %v54_v51  ;;  %v5183_v11 = vcombine.low %v51_v52, %v55_v53  ;;  %v4639_v51 = vld [vmem:[#allocation4 + $0xcc] ss:$16 sps:$4 sm:$0xff]  }
  0x30   :  { %1886 = vmatpush1.bf16.msra.mxu0 %v4543_v29  ;;  %1814 = vmatprep.subr.bf16.mxu1 %v4544_v30  ;;  %v4576_v56 = vld [vmem:[#allocation4 + $0x384] ss:$16 sps:$4 sm:$0xff]   ;;  %v4579_v59 = vld [vmem:[#allocation4 + $0x380] ss:$16 sps:$4 sm:$0xff]   ;;  %v4621_v30 = vld [vmem:[#allocation4 + $0x6c] ss:$16 sps:$4 sm:$0xff]  }
  0x31   :  { %1887 = vmatprep.subr.bf16.mxu0 %v4546_v31  ;;  %1832 = vmatprep.mubr.bf16.mxu1 %v5175_v55  ;;  %v4580_v60 = vld [vmem:[#allocation4 + $0x1a4] ss:$16 sps:$4 sm:$0xff]   ;;  %v4584_v62 = vld [vmem:[#allocation4 + $0x1a0] ss:$16 sps:$4 sm:$0xff]  }
  0x32   :  { %1905 = vmatprep.mubr.bf16.mxu0 %v5177_v57  ;;  %v4582_v61 = vld [vmem:[#allocation4 + $0x3a4] ss:$16 sps:$4 sm:$0xff]   ;;  %v4585_v63 = vld [vmem:[#allocation4 + $0x3a0] ss:$16 sps:$4 sm:$0xff]  }
  0x33   :  { %1815 = vmatpush1.bf16.msra.mxu1 %v4548_v32  ;;  %v4586_v0 = vld [vmem:[#allocation4 + $0x1c4] ss:$16 sps:$4 sm:$0xff]   ;;  %v4590_v2 = vld [vmem:[#allocation4 + $0x1c0] ss:$16 sps:$4 sm:$0xff]  }
  0x34   :  { %1888 = vmatpush1.bf16.msra.mxu0 %v4549_v33  ;;  %1816 = vmatprep.subr.bf16.mxu1 %v4550_v34  ;;  %v4588_v1 = vld [vmem:[#allocation4 + $0x3c4] ss:$16 sps:$4 sm:$0xff]   ;;  %v4591_v3 = vld [vmem:[#allocation4 + $0x3c0] ss:$16 sps:$4 sm:$0xff]   ;;  %v4619_v33 = vld [vmem:[#allocation4 + $0x68] ss:$16 sps:$4 sm:$0xff]  }
  0x35   :  { %1889 = vmatprep.subr.bf16.mxu0 %v4552_v35  ;;  %v4592_v4 = vld [vmem:[#allocation4 + $0x1e4] ss:$16 sps:$4 sm:$0xff]   ;;  %v4596_v6 = vld [vmem:[#allocation4 + $0x1e0] ss:$16 sps:$4 sm:$0xff]   ;;  %v4627_v35 = vld [vmem:[#allocation4 + $0x8c] ss:$16 sps:$4 sm:$0xff]  }
  0x36   :  { %v4594_v5 = vld [vmem:[#allocation4 + $0x3e4] ss:$16 sps:$4 sm:$0xff]   ;;  %v4597_v7 = vld [vmem:[#allocation4 + $0x3e0] ss:$16 sps:$4 sm:$0xff]  }
  0x37   :  { %1817 = vmatpush1.bf16.msra.mxu1 %v4554_v36  ;;  %v4600_v8 = vld [vmem:[#allocation4 + $0x404] ss:$16 sps:$4 sm:$0xff]   ;;  %v4598_v12 = vld [vmem:[#allocation4 + $0x400] ss:$16 sps:$4 sm:$0xff]  }
  0x38   :  { %1890 = vmatpush1.bf16.msra.mxu0 %v4555_v37  ;;  %1818 = vmatprep.subr.bf16.mxu1 %v4556_v38  ;;  %v4606_v14 = vld [vmem:[#allocation4 + $0x424] ss:$16 sps:$4 sm:$0xff]   ;;  %v4604_v16 = vld [vmem:[#allocation4 + $0x420] ss:$16 sps:$4 sm:$0xff]  }
  0x39   :  { %1891 = vmatprep.subr.bf16.mxu0 %v4558_v39  ;;  %v4612_v18 = vld [vmem:[#allocation4 + $0x444] ss:$16 sps:$4 sm:$0xff]   ;;  %v4610_v20 = vld [vmem:[#allocation4 + $0x440] ss:$16 sps:$4 sm:$0xff]  }
  0x3a   :  { %v58_v22 = vld [vmem:[%s6162_s0 + $0x40] sm:$0xff]  ;;  %v59_v24 = vld [vmem:[%s6162_s0 + $0x48] sm:$0xff] }
  0x3b   :  { %1819 = vmatpush1.bf16.msra.mxu1 %v4560_v40  ;;  %v62_v23 = vld [vmem:[%s6162_s0 + $0x60] sm:$0xff]  ;;  %v63_v25 = vld [vmem:[%s6162_s0 + $0x68] sm:$0xff] }
  0x3c   :  { %1892 = vmatpush1.bf16.msra.mxu0 %v4561_v41  ;;  %1820 = vmatprep.subr.bf16.mxu1 %v4562_v42  ;;  %v4618_v26 = vld [vmem:[#allocation4 + $0x464] ss:$16 sps:$4 sm:$0xff]   ;;  %v5199_v27 = vcombine.high %v58_v22, %v62_v23  ;;  %v5201_v28 = vcombine.low %v58_v22, %v62_v23  ;;  %v5203_v29 = vcombine.high %v59_v24, %v63_v25  ;;  %v4616_v32 = vld [vmem:[#allocation4 + $0x460] ss:$16 sps:$4 sm:$0xff]   ;;  %v4625_v42 = vld [vmem:[#allocation4 + $0x88] ss:$16 sps:$4 sm:$0xff]  }
  0x3d   :  { %1893 = vmatprep.subr.bf16.mxu0 %v4564_v43  ;;  %v5205_v31 = vcombine.low %v59_v24, %v63_v25  ;;  %v4624_v34 = vld [vmem:[#allocation4 + $0x484] ss:$16 sps:$4 sm:$0xff]   ;;  %v4622_v41 = vld [vmem:[#allocation4 + $0x480] ss:$16 sps:$4 sm:$0xff]   ;;  %v4667_v23 = vld [vmem:[#allocation4 + $0x168] ss:$16 sps:$4 sm:$0xff]  }
  0x3e   :  { %v66_v36 = vld [vmem:[%s6162_s0 + $0x80] sm:$0xff]  ;;  %v67_v39 = vld [vmem:[%s6162_s0 + $0x88] sm:$0xff] }
  0x3f   :  { %1821 = vmatpush1.bf16.msra.mxu1 %v4566_v44  ;;  %v70_v37 = vld [vmem:[%s6162_s0 + $0xa0] sm:$0xff]  ;;  %v71_v40 = vld [vmem:[%s6162_s0 + $0xa8] sm:$0xff] }
  0x40   :  { %1894 = vmatpush1.bf16.msra.mxu0 %v4567_v45  ;;  %1822 = vmatprep.subr.bf16.mxu1 %v4568_v46  ;;  %v5217_v38 = vcombine.high %v66_v36, %v70_v37  ;;  %v5225_v43 = vcombine.low %v66_v36, %v70_v37  ;;  %v5227_v44 = vcombine.high %v67_v39, %v71_v40  ;;  %v4630_v46 = vld [vmem:[#allocation4 + $0x4a4] ss:$16 sps:$4 sm:$0xff]   ;;  %v4664_v22 = vld [vmem:[#allocation4 + $0x560] ss:$16 sps:$4 sm:$0xff]   ;;  %v4675_v25 = vld [vmem:[#allocation4 + $0x18c] ss:$16 sps:$4 sm:$0xff]  }
  0x41   :  { %1895 = vmatprep.subr.bf16.mxu0 %v4570_v47  ;;  %v5229_v45 = vcombine.low %v67_v39, %v71_v40  ;;  %v4633_v47 = vld [vmem:[#allocation4 + $0xac] ss:$16 sps:$4 sm:$0xff]   ;;  %v4636_v50 = vld [vmem:[#allocation4 + $0x4c4] ss:$16 sps:$4 sm:$0xff]   ;;  %v4682_v39 = vld [vmem:[#allocation4 + $0x5c0] ss:$16 sps:$4 sm:$0xff]  }
  0x42   :  { %v74_v52 = vld [vmem:[%s6162_s0 + $0xc0] sm:$0xff]  ;;  %v4685_v40 = vld [vmem:[#allocation4 + $0x1c8] ss:$16 sps:$4 sm:$0xff]  }
  0x43   :  { %1823 = vmatpush1.bf16.msra.mxu1 %v4572_v48  ;;  %v4628_v48 = vld [vmem:[#allocation4 + $0x4a0] ss:$16 sps:$4 sm:$0xff]   ;;  %v4672_v24 = vld [vmem:[#allocation4 + $0x584] ss:$16 sps:$4 sm:$0xff]   ;;  %v4687_v37 = vld [vmem:[#allocation4 + $0x1cc] ss:$16 sps:$4 sm:$0xff]  }
  0x44   :  { %1896 = vmatpush1.bf16.msra.mxu0 %v4573_v49  ;;  %1824 = vmatprep.subr.bf16.mxu1 %v4574_v54  ;;  %v4631_v49 = vld [vmem:[#allocation4 + $0xa8] ss:$16 sps:$4 sm:$0xff]   ;;  %v78_v53 = vld [vmem:[%s6162_s0 + $0xe0] sm:$0xff] }
  0x45   :  { %1897 = vmatprep.subr.bf16.mxu0 %v4576_v56  ;;  %v75_v54 = vld [vmem:[%s6162_s0 + $0xc8] sm:$0xff]  ;;  %v5244_v56 = vcombine.high %v74_v52, %v78_v53 }
  0x46   :  { %v4684_v36 = vld [vmem:[#allocation4 + $0x5c4] ss:$16 sps:$4 sm:$0xff]  }
  0x47   :  { %1825 = vmatpush1.bf16.msra.mxu1 %v4578_v58  ;;  %v79_v58 = vld [vmem:[%s6162_s0 + $0xe8] sm:$0xff] }
  0x48   :  { %1898 = vmatpush1.bf16.msra.mxu0 %v4579_v59  ;;  %1826 = vmatprep.subr.bf16.mxu1 %v4580_v60  ;;  %v5249_v59 = vcombine.high %v75_v54, %v79_v58  ;;  %v4634_v60 = vld [vmem:[#allocation4 + $0x4c0] ss:$16 sps:$4 sm:$0xff]  }
  0x49   :  { %1899 = vmatprep.subr.bf16.mxu0 %v4582_v61  ;;  %v4637_v61 = vld [vmem:[#allocation4 + $0xc8] ss:$16 sps:$4 sm:$0xff]  }
  0x4b   :  { %1827 = vmatpush1.bf16.msra.mxu1 %v4584_v62  ;;  %v5252_v62 = vcombine.low %v74_v52, %v78_v53  ;;  %v64_v52 = vld [vmem:[%s6162_s0 + $0x70] sm:$0xff] }
  0x4c   :  { %1900 = vmatpush1.bf16.msra.mxu0 %v4585_v63  ;;  %1828 = vmatprep.subr.bf16.mxu1 %v4586_v0  ;;  %v5254_v63 = vcombine.low %v75_v54, %v79_v58  ;;  %v4642_v0 = vld [vmem:[#allocation4 + $0x4e4] ss:$16 sps:$4 sm:$0xff]   ;;  %v4694_v53 = vld [vmem:[#allocation4 + $0x600] ss:$16 sps:$4 sm:$0xff]   ;;  %v4697_v54 = vld [vmem:[#allocation4 + $0x208] ss:$16 sps:$4 sm:$0xff]  }
  0x4d   :  { %1901 = vmatprep.subr.bf16.mxu0 %v4588_v1  ;;  %v4645_v1 = vld [vmem:[#allocation4 + $0xec] ss:$16 sps:$4 sm:$0xff]   ;;  %v4702_v58 = vld [vmem:[#allocation4 + $0x624] ss:$16 sps:$4 sm:$0xff]  }
  0x4f   :  { %1829 = vmatpush1.bf16.msra.mxu1 %v4590_v2  ;;  %v5260_v2 = vld [vmem:[%s6162_s0 + $0x10] sm:$0xff] }
  0x50   :  { %1902 = vmatpush1.bf16.msra.mxu0 %v4591_v3  ;;  %1830 = vmatprep.subr.bf16.mxu1 %v4592_v4  ;;  %v5267_v3 = vld [vmem:[%s6162_s0 + $0x30] sm:$0xff] }
  0x51   :  { %1903 = vmatprep.subr.bf16.mxu0 %v4594_v5  ;;  %v4640_v4 = vld [vmem:[#allocation4 + $0x4e0] ss:$16 sps:$4 sm:$0xff]   ;;  %v4643_v5 = vld [vmem:[#allocation4 + $0xe8] ss:$16 sps:$4 sm:$0xff]  }
  0x53   :  { %1831 = vmatpush1.bf16.msra.mxu1 %v4596_v6  ;;  %v5271_v6 = vcombine.high %v5260_v2, %v5267_v3 }
  0x54   :  { %1904 = vmatpush1.bf16.msra.mxu0 %v4597_v7  ;;  %2092 = vmatprep.subr.bf16.mxu1 %v4603_v9  ;;  %v4648_v7 = vld [vmem:[#allocation4 + $0x504] ss:$16 sps:$4 sm:$0xff]   ;;  %v4646_v9 = vld [vmem:[#allocation4 + $0x500] ss:$16 sps:$4 sm:$0xff]  }
  0x55   :  { %1946 = vmatprep.subr.bf16.mxu0 %v4600_v8  ;;  %v4651_v8 = vld [vmem:[#allocation4 + $0x10c] ss:$16 sps:$4 sm:$0xff]  }
  0x56   :  { %1833 = vmatmul.mubr.bf16.vlgmr.msra.gmra.mrb[0].mxu1 %v5181_v10 }
  0x57   :  { %1906 = vmatmul.mubr.bf16.vlgmr.msra.gmra.mrb[0].mxu0 %v5183_v11  ;;  %2093 = vmatpush1.bf16.msra.mxu1 %v4601_v13  ;;  %v4654_v13 = vld [vmem:[#allocation4 + $0x524] ss:$16 sps:$4 sm:$0xff]  }
  0x58   :  { %1947 = vmatpush1.bf16.msra.mxu0 %v4598_v12  ;;  %2094 = vmatprep.subr.bf16.mxu1 %v4609_v15  ;;  %v4649_v12 = vld [vmem:[#allocation4 + $0x108] ss:$16 sps:$4 sm:$0xff]   ;;  %v4652_v15 = vld [vmem:[#allocation4 + $0x520] ss:$16 sps:$4 sm:$0xff]  }
  0x59   :  { %1948 = vmatprep.subr.bf16.mxu0 %v4606_v14  ;;  %1842 = vmatprep.mubr.bf16.mxu1 %v5199_v27  ;;  %v4657_v14 = vld [vmem:[#allocation4 + $0x12c] ss:$16 sps:$4 sm:$0xff]  }
  0x5a   :  { %1915 = vmatprep.mubr.bf16.mxu0 %v5203_v29 }
  0x5b   :  { %2095 = vmatpush1.bf16.msra.mxu1 %v4607_v17  ;;  %v4660_v17 = vld [vmem:[#allocation4 + $0x544] ss:$16 sps:$4 sm:$0xff]  }
  0x5c   :  { %1949 = vmatpush1.bf16.msra.mxu0 %v4604_v16  ;;  %2096 = vmatprep.subr.bf16.mxu1 %v4615_v19  ;;  %v4655_v16 = vld [vmem:[#allocation4 + $0x128] ss:$16 sps:$4 sm:$0xff]   ;;  %v4658_v19 = vld [vmem:[#allocation4 + $0x540] ss:$16 sps:$4 sm:$0xff]  }
  0x5d   :  { %1950 = vmatprep.subr.bf16.mxu0 %v4612_v18  ;;  %v4663_v18 = vld [vmem:[#allocation4 + $0x14c] ss:$16 sps:$4 sm:$0xff]  }
  0x5e   :  { %1843 = vmatmul.mubr.bf16.gmra.mrb[4].mxu1 %v5201_v28 }
  0x5f   :  { %1916 = vmatmul.mubr.bf16.gmra.mrb[4].mxu0 %v5205_v31  ;;  %2097 = vmatpush1.bf16.msra.mxu1 %v4613_v21  ;;  %v4669_v21 = vld [vmem:[#allocation4 + $0x16c] ss:$16 sps:$4 sm:$0xff]  }
  0x60   :  { %1951 = vmatpush1.bf16.msra.mxu0 %v4610_v20  ;;  %2098 = vmatprep.subr.bf16.mxu1 %v4621_v30  ;;  %v4666_v20 = vld [vmem:[#allocation4 + $0x564] ss:$16 sps:$4 sm:$0xff]   ;;  %v4673_v30 = vld [vmem:[#allocation4 + $0x188] ss:$16 sps:$4 sm:$0xff]  }
  0x61   :  { %1952 = vmatprep.subr.bf16.mxu0 %v4618_v26  ;;  %1852 = vmatprep.mubr.bf16.mxu1 %v5217_v38  ;;  %v4670_v26 = vld [vmem:[#allocation4 + $0x580] ss:$16 sps:$4 sm:$0xff]  }
  0x62   :  { %1925 = vmatprep.mubr.bf16.mxu0 %v5227_v44 }
  0x63   :  { %2099 = vmatpush1.bf16.msra.mxu1 %v4619_v33  ;;  %v4681_v33 = vld [vmem:[#allocation4 + $0x1ac] ss:$16 sps:$4 sm:$0xff]  }
  0x64   :  { %1953 = vmatpush1.bf16.msra.mxu0 %v4616_v32  ;;  %2100 = vmatprep.subr.bf16.mxu1 %v4627_v35  ;;  %v4678_v32 = vld [vmem:[#allocation4 + $0x5a4] ss:$16 sps:$4 sm:$0xff]   ;;  %v4679_v35 = vld [vmem:[#allocation4 + $0x1a8] ss:$16 sps:$4 sm:$0xff]  }
  0x65   :  { %1954 = vmatprep.subr.bf16.mxu0 %v4624_v34  ;;  %v4676_v34 = vld [vmem:[#allocation4 + $0x5a0] ss:$16 sps:$4 sm:$0xff]  }
  0x66   :  { %1853 = vmatmul.mubr.bf16.gmra.mrb[8].mxu1 %v5225_v43 }
  0x67   :  { %1926 = vmatmul.mubr.bf16.gmra.mrb[8].mxu0 %v5229_v45  ;;  %2101 = vmatpush1.bf16.msra.mxu1 %v4625_v42  ;;  %v4693_v42 = vld [vmem:[#allocation4 + $0x1ec] ss:$16 sps:$4 sm:$0xff]  }
  0x68   :  { %1955 = vmatpush1.bf16.msra.mxu0 %v4622_v41  ;;  %2102 = vmatprep.subr.bf16.mxu1 %v4633_v47  ;;  %v4690_v41 = vld [vmem:[#allocation4 + $0x5e4] ss:$16 sps:$4 sm:$0xff]   ;;  %v4691_v47 = vld [vmem:[#allocation4 + $0x1e8] ss:$16 sps:$4 sm:$0xff]  }
  0x69   :  { %1956 = vmatprep.subr.bf16.mxu0 %v4630_v46  ;;  %1862 = vmatprep.mubr.bf16.mxu1 %v5244_v56  ;;  %v4688_v46 = vld [vmem:[#allocation4 + $0x5e0] ss:$16 sps:$4 sm:$0xff]  }
  0x6a   :  { %1935 = vmatprep.mubr.bf16.mxu0 %v5249_v59 }
  0x6b   :  { %2103 = vmatpush1.bf16.msra.mxu1 %v4631_v49  ;;  %v4699_v49 = vld [vmem:[#allocation4 + $0x20c] ss:$16 sps:$4 sm:$0xff]  }
  0x6c   :  { %1957 = vmatpush1.bf16.msra.mxu0 %v4628_v48  ;;  %2104 = vmatprep.subr.bf16.mxu1 %v4639_v51  ;;  %v4696_v48 = vld [vmem:[#allocation4 + $0x604] ss:$16 sps:$4 sm:$0xff]   ;;  %v5280_v51 = vcombine.low %v5260_v2, %v5267_v3  ;;  %v4711_v3 = vld [vmem:[#allocation4 + $0x24c] ss:$16 sps:$4 sm:$0xff]  }
  0x6d   :  { %1958 = vmatprep.subr.bf16.mxu0 %v4636_v50  ;;  %v60_v50 = vld [vmem:[%s6162_s0 + $0x50] sm:$0xff] }
  0x6e   :  { %1863 = vmatmul.mubr.bf16.gmra.mrb[12].mxu1 %v5252_v62  ;;  %v4708_v2 = vld [vmem:[#allocation4 + $0x644] ss:$16 sps:$4 sm:$0xff]  }
  0x6f   :  { %1936 = vmatmul.mubr.bf16.gmra.mrb[12].mxu0 %v5254_v63  ;;  %2105 = vmatpush1.bf16.msra.mxu1 %v4637_v61  ;;  %v5285_v61 = vcombine.high %v60_v50, %v64_v52 }
  0x70   :  { %1959 = vmatpush1.bf16.msra.mxu0 %v4634_v60  ;;  %2106 = vmatprep.subr.bf16.mxu1 %v4645_v1  ;;  %v4705_v60 = vld [vmem:[#allocation4 + $0x22c] ss:$16 sps:$4 sm:$0xff]   ;;  %v4703_v1 = vld [vmem:[#allocation4 + $0x228] ss:$16 sps:$4 sm:$0xff]  }
  0x71   :  { %1960 = vmatprep.subr.bf16.mxu0 %v4642_v0  ;;  %1978 = vmatprep.mubr.bf16.mxu0 %v5271_v6  ;;  %v4700_v0 = vld [vmem:[#allocation4 + $0x620] ss:$16 sps:$4 sm:$0xff]  }
  0x72   :  { %2124 = vmatprep.mubr.bf16.mxu1 %v5175_v55  ;;  %v4661_v55 = vld [vmem:[#allocation4 + $0x148] ss:$16 sps:$4 sm:$0xff]  }
  0x73   :  { %2107 = vmatpush1.bf16.msra.mxu1 %v4643_v5  ;;  %v68_v5 = vld [vmem:[%s6162_s0 + $0x90] sm:$0xff] }
  0x74   :  { %1961 = vmatpush1.bf16.msra.mxu0 %v4640_v4  ;;  %2108 = vmatprep.subr.bf16.mxu1 %v4651_v8  ;;  %v5291_v4 = vcombine.low %v60_v50, %v64_v52  ;;  %v4709_v8 = vld [vmem:[#allocation4 + $0x248] ss:$16 sps:$4 sm:$0xff]   ;;  %v4759_v50 = vld [vmem:[#allocation4 + $0x34c] ss:$16 sps:$4 sm:$0xff]   ;;  %v4754_v52 = vld [vmem:[#allocation4 + $0x740] ss:$16 sps:$4 sm:$0xff]  }
  0x75   :  { %1962 = vmatprep.subr.bf16.mxu0 %v4648_v7  ;;  %v4706_v7 = vld [vmem:[#allocation4 + $0x640] ss:$16 sps:$4 sm:$0xff]  }
  0x77   :  { %2109 = vmatpush1.bf16.msra.mxu1 %v4649_v12  ;;  %v4717_v12 = vld [vmem:[#allocation4 + $0x26c] ss:$16 sps:$4 sm:$0xff]  }
  0x78   :  { %1963 = vmatpush1.bf16.msra.mxu0 %v4646_v9  ;;  %2110 = vmatprep.subr.bf16.mxu1 %v4657_v14  ;;  %v4714_v9 = vld [vmem:[#allocation4 + $0x664] ss:$16 sps:$4 sm:$0xff]   ;;  %v4715_v14 = vld [vmem:[#allocation4 + $0x268] ss:$16 sps:$4 sm:$0xff]  }
  0x79   :  { %1964 = vmatprep.subr.bf16.mxu0 %v4654_v13 }
  0x7b   :  { %2111 = vmatpush1.bf16.msra.mxu1 %v4655_v16  ;;  %v4723_v16 = vld [vmem:[#allocation4 + $0x28c] ss:$16 sps:$4 sm:$0xff]  }
  0x7c   :  { %1965 = vmatpush1.bf16.msra.mxu0 %v4652_v15  ;;  %2112 = vmatprep.subr.bf16.mxu1 %v4663_v18  ;;  %v4720_v15 = vld [vmem:[#allocation4 + $0x684] ss:$16 sps:$4 sm:$0xff]  }
  0x7d   :  { %1966 = vmatprep.subr.bf16.mxu0 %v4660_v17  ;;  %v76_v17 = vld [vmem:[%s6162_s0 + $0xd0] sm:$0xff] }
  0x7f   :  { %2113 = vmatpush1.bf16.msra.mxu1 %v4661_v55  ;;  %v4721_v55 = vld [vmem:[#allocation4 + $0x288] ss:$16 sps:$4 sm:$0xff]  }
  0x80   :  { %1967 = vmatpush1.bf16.msra.mxu0 %v4658_v19  ;;  %2114 = vmatprep.subr.bf16.mxu1 %v4669_v21  ;;  %v4718_v19 = vld [vmem:[#allocation4 + $0x680] ss:$16 sps:$4 sm:$0xff]   ;;  %v4729_v21 = vld [vmem:[#allocation4 + $0x2ac] ss:$16 sps:$4 sm:$0xff]  }
  0x81   :  { %1968 = vmatprep.subr.bf16.mxu0 %v4666_v20  ;;  %v4726_v20 = vld [vmem:[#allocation4 + $0x6a4] ss:$16 sps:$4 sm:$0xff]  }
  0x83   :  { %2115 = vmatpush1.bf16.msra.mxu1 %v4667_v23  ;;  %v4727_v23 = vld [vmem:[#allocation4 + $0x2a8] ss:$16 sps:$4 sm:$0xff]  }
  0x84   :  { %1969 = vmatpush1.bf16.msra.mxu0 %v4664_v22  ;;  %2116 = vmatprep.subr.bf16.mxu1 %v4675_v25  ;;  %v4735_v25 = vld [vmem:[#allocation4 + $0x2cc] ss:$16 sps:$4 sm:$0xff]  }
  0x85   :  { %1970 = vmatprep.subr.bf16.mxu0 %v4672_v24  ;;  %v4732_v24 = vld [vmem:[#allocation4 + $0x6c4] ss:$16 sps:$4 sm:$0xff]  }
  0x87   :  { %2117 = vmatpush1.bf16.msra.mxu1 %v4673_v30  ;;  %v4733_v30 = vld [vmem:[#allocation4 + $0x2c8] ss:$16 sps:$4 sm:$0xff]  }
  0x88   :  { %1971 = vmatpush1.bf16.msra.mxu0 %v4670_v26  ;;  %2118 = vmatprep.subr.bf16.mxu1 %v4681_v33  ;;  %v4730_v26 = vld [vmem:[#allocation4 + $0x6c0] ss:$16 sps:$4 sm:$0xff]   ;;  %v5324_v33 = vld [vmem:[%s6162_s0 + $0x18] sm:$0xff] }
  0x89   :  { %1972 = vmatprep.subr.bf16.mxu0 %v4678_v32 }
  0x8b   :  { %2119 = vmatpush1.bf16.msra.mxu1 %v4679_v35  ;;  %v4741_v35 = vld [vmem:[#allocation4 + $0x2ec] ss:$16 sps:$4 sm:$0xff]  }
  0x8c   :  { %1973 = vmatpush1.bf16.msra.mxu0 %v4676_v34  ;;  %2120 = vmatprep.subr.bf16.mxu1 %v4687_v37  ;;  %v4738_v34 = vld [vmem:[#allocation4 + $0x6e4] ss:$16 sps:$4 sm:$0xff]   ;;  %v4739_v37 = vld [vmem:[#allocation4 + $0x2e8] ss:$16 sps:$4 sm:$0xff]  }
  0x8d   :  { %1974 = vmatprep.subr.bf16.mxu0 %v4684_v36  ;;  %v4736_v36 = vld [vmem:[#allocation4 + $0x6e0] ss:$16 sps:$4 sm:$0xff]  }
  0x8f   :  { %2121 = vmatpush1.bf16.msra.mxu1 %v4685_v40  ;;  %v4747_v40 = vld [vmem:[#allocation4 + $0x30c] ss:$16 sps:$4 sm:$0xff]  }
  0x90   :  { %1975 = vmatpush1.bf16.msra.mxu0 %v4682_v39  ;;  %2122 = vmatprep.subr.bf16.mxu1 %v4693_v42  ;;  %v4744_v39 = vld [vmem:[#allocation4 + $0x704] ss:$16 sps:$4 sm:$0xff]   ;;  %v4745_v42 = vld [vmem:[#allocation4 + $0x308] ss:$16 sps:$4 sm:$0xff]  }
  0x91   :  { %1976 = vmatprep.subr.bf16.mxu0 %v4690_v41  ;;  %v4742_v41 = vld [vmem:[#allocation4 + $0x700] ss:$16 sps:$4 sm:$0xff]  }
  0x93   :  { %2123 = vmatpush1.bf16.msra.mxu1 %v4691_v47  ;;  %v4753_v47 = vld [vmem:[#allocation4 + $0x32c] ss:$16 sps:$4 sm:$0xff]  }
  0x94   :  { %1977 = vmatpush1.bf16.msra.mxu0 %v4688_v46  ;;  %2165 = vmatprep.subr.bf16.mxu1 %v4699_v49  ;;  %v4750_v46 = vld [vmem:[#allocation4 + $0x724] ss:$16 sps:$4 sm:$0xff]  }
  0x95   :  { %2019 = vmatprep.subr.bf16.mxu0 %v4696_v48  ;;  %v4748_v48 = vld [vmem:[#allocation4 + $0x720] ss:$16 sps:$4 sm:$0xff]   ;;  %v4756_v49 = vld [vmem:[#allocation4 + $0x744] ss:$16 sps:$4 sm:$0xff]  }
  0x96   :  { %2125 = vmatmul.mubr.bf16.vlgmr.msra.gmra.mrb[16].mxu1 %v5181_v10  ;;  %v72_v10 = vld [vmem:[%s6162_s0 + $0xb0] sm:$0xff] }
  0x97   :  { %1979 = vmatmul.mubr.bf16.vlgmr.msra.gmra.mrb[0].mxu0 %v5280_v51  ;;  %2166 = vmatpush1.bf16.msra.mxu1 %v4697_v54  ;;  %v5299_v13 = vcombine.high %v68_v5, %v72_v10  ;;  %v5308_v18 = vcombine.low %v68_v5, %v72_v10  ;;  %v4765_v54 = vld [vmem:[#allocation4 + $0x36c] ss:$16 sps:$4 sm:$0xff]   ;;  %v4774_v5 = vld [vmem:[#allocation4 + $0x7a4] ss:$16 sps:$4 sm:$0xff]  }
  0x98   :  { %2020 = vmatpush1.bf16.msra.mxu0 %v4694_v53  ;;  %2167 = vmatprep.subr.bf16.mxu1 %v4705_v60  ;;  %v4762_v53 = vld [vmem:[#allocation4 + $0x764] ss:$16 sps:$4 sm:$0xff]   ;;  %v4763_v60 = vld [vmem:[#allocation4 + $0x368] ss:$16 sps:$4 sm:$0xff]   ;;  %v4777_v10 = vld [vmem:[#allocation4 + $0x3ac] ss:$16 sps:$4 sm:$0xff]  }
  0x99   :  { %2021 = vmatprep.subr.bf16.mxu0 %v4702_v58  ;;  %1988 = vmatprep.mubr.bf16.mxu0 %v5285_v61  ;;  %v4760_v58 = vld [vmem:[#allocation4 + $0x760] ss:$16 sps:$4 sm:$0xff]  }
  0x9a   :  { %2134 = vmatprep.mubr.bf16.mxu1 %v5199_v27  ;;  %v4712_v27 = vld [vmem:[#allocation4 + $0x660] ss:$16 sps:$4 sm:$0xff]  }
  0x9b   :  { %2168 = vmatpush1.bf16.msra.mxu1 %v4703_v1  ;;  %v4771_v1 = vld [vmem:[#allocation4 + $0x38c] ss:$16 sps:$4 sm:$0xff]  }
  0x9c   :  { %2022 = vmatpush1.bf16.msra.mxu0 %v4700_v0  ;;  %2169 = vmatprep.subr.bf16.mxu1 %v4711_v3  ;;  %v4768_v0 = vld [vmem:[#allocation4 + $0x784] ss:$16 sps:$4 sm:$0xff]   ;;  %v4769_v3 = vld [vmem:[#allocation4 + $0x388] ss:$16 sps:$4 sm:$0xff]  }
  0x9d   :  { %2023 = vmatprep.subr.bf16.mxu0 %v4708_v2  ;;  %v4766_v2 = vld [vmem:[#allocation4 + $0x780] ss:$16 sps:$4 sm:$0xff]  }
  0x9e   :  { %2135 = vmatmul.mubr.bf16.gmra.mrb[20].mxu1 %v5201_v28  ;;  %v80_v28 = vld [vmem:[%s6162_s0 + $0xf0] sm:$0xff] }
  0x9f   :  { %1989 = vmatmul.mubr.bf16.gmra.mrb[4].mxu0 %v5291_v4  ;;  %2170 = vmatpush1.bf16.msra.mxu1 %v4709_v8  ;;  %v5313_v22 = vcombine.high %v76_v17, %v80_v28  ;;  %v5319_v32 = vcombine.low %v76_v17, %v80_v28  ;;  %v4775_v8 = vld [vmem:[#allocation4 + $0x3a8] ss:$16 sps:$4 sm:$0xff]   ;;  %v4784_v17 = vld [vmem:[#allocation4 + $0x7e0] ss:$16 sps:$4 sm:$0xff]  }
  0xa0   :  { %2024 = vmatpush1.bf16.msra.mxu0 %v4706_v7  ;;  %2171 = vmatprep.subr.bf16.mxu1 %v4717_v12  ;;  %v4772_v7 = vld [vmem:[#allocation4 + $0x7a0] ss:$16 sps:$4 sm:$0xff]   ;;  %v4783_v12 = vld [vmem:[#allocation4 + $0x3cc] ss:$16 sps:$4 sm:$0xff]   ;;  %v4787_v28 = vld [vmem:[#allocation4 + $0x3e8] ss:$16 sps:$4 sm:$0xff]  }
  0xa1   :  { %2025 = vmatprep.subr.bf16.mxu0 %v4714_v9  ;;  %1998 = vmatprep.mubr.bf16.mxu0 %v5299_v13  ;;  %v4780_v9 = vld [vmem:[#allocation4 + $0x7c4] ss:$16 sps:$4 sm:$0xff]  }
  0xa2   :  { %2144 = vmatprep.mubr.bf16.mxu1 %v5217_v38  ;;  %v4724_v38 = vld [vmem:[#allocation4 + $0x6a0] ss:$16 sps:$4 sm:$0xff]  }
  0xa3   :  { %2172 = vmatpush1.bf16.msra.mxu1 %v4715_v14  ;;  %v4781_v14 = vld [vmem:[#allocation4 + $0x3c8] ss:$16 sps:$4 sm:$0xff]  }
  0xa4   :  { %2026 = vmatpush1.bf16.msra.mxu0 %v4712_v27  ;;  %2173 = vmatprep.subr.bf16.mxu1 %v4723_v16  ;;  %v4778_v27 = vld [vmem:[#allocation4 + $0x7c0] ss:$16 sps:$4 sm:$0xff]   ;;  %v4789_v16 = vld [vmem:[#allocation4 + $0x3ec] ss:$16 sps:$4 sm:$0xff]  }
  0xa5   :  { %2027 = vmatprep.subr.bf16.mxu0 %v4720_v15  ;;  %v4786_v15 = vld [vmem:[#allocation4 + $0x7e4] ss:$16 sps:$4 sm:$0xff]  }
  0xa6   :  { %2145 = vmatmul.mubr.bf16.gmra.mrb[24].mxu1 %v5225_v43  ;;  %v5329_v43 = vld [vmem:[%s6162_s0 + $0x38] sm:$0xff] }
  0xa7   :  { %1999 = vmatmul.mubr.bf16.gmra.mrb[8].mxu0 %v5308_v18  ;;  %2174 = vmatpush1.bf16.msra.mxu1 %v4721_v55  ;;  %v61_v55 = vld [vmem:[%s6162_s0 + $0x58] sm:$0xff] }
  0xa8   :  { %2028 = vmatpush1.bf16.msra.mxu0 %v4718_v19  ;;  %2175 = vmatprep.subr.bf16.mxu1 %v4729_v21  ;;  %v4792_v19 = vld [vmem:[#allocation4 + $0x40c] ss:$16 sps:$4 sm:$0xff]   ;;  %v4790_v21 = vld [vmem:[#allocation4 + $0x408] ss:$16 sps:$4 sm:$0xff]  }
  0xa9   :  { %2029 = vmatprep.subr.bf16.mxu0 %v4726_v20  ;;  %2008 = vmatprep.mubr.bf16.mxu0 %v5313_v22  ;;  %v65_v20 = vld [vmem:[%s6162_s0 + $0x78] sm:$0xff] }
  0xaa   :  { %2154 = vmatprep.mubr.bf16.mxu1 %v5244_v56  ;;  %v5333_v56 = vcombine.high %v5324_v33, %v5329_v43 }
  0xab   :  { %2176 = vmatpush1.bf16.msra.mxu1 %v4727_v23  ;;  %v4795_v23 = vld [vmem:[#allocation4 + $0x42c] ss:$16 sps:$4 sm:$0xff]  }
  0xac   :  { %2030 = vmatpush1.bf16.msra.mxu0 %v4724_v38  ;;  %2177 = vmatprep.subr.bf16.mxu1 %v4735_v25  ;;  %v5347_v38 = vcombine.low %v5324_v33, %v5329_v43  ;;  %v4793_v25 = vld [vmem:[#allocation4 + $0x428] ss:$16 sps:$4 sm:$0xff]  }
  0xad   :  { %2031 = vmatprep.subr.bf16.mxu0 %v4732_v24  ;;  %v5349_v24 = vcombine.high %v61_v55, %v65_v20  ;;  %v73_v33 = vld [vmem:[%s6162_s0 + $0xb8] sm:$0xff] }
  0xae   :  { %2155 = vmatmul.mubr.bf16.gmra.mrb[28].mxu1 %v5252_v62  ;;  %v4751_v62 = vld [vmem:[#allocation4 + $0x328] ss:$16 sps:$4 sm:$0xff]  }
  0xaf   :  { %2009 = vmatmul.mubr.bf16.gmra.mrb[12].mxu0 %v5319_v32  ;;  %2178 = vmatpush1.bf16.msra.mxu1 %v4733_v30  ;;  %v69_v30 = vld [vmem:[%s6162_s0 + $0x98] sm:$0xff] }
  0xb0   :  { %2032 = vmatpush1.bf16.msra.mxu0 %v4730_v26  ;;  %2179 = vmatprep.subr.bf16.mxu1 %v4741_v35  ;;  %v4798_v26 = vld [vmem:[#allocation4 + $0x44c] ss:$16 sps:$4 sm:$0xff]   ;;  %v4796_v43 = vld [vmem:[#allocation4 + $0x448] ss:$16 sps:$4 sm:$0xff]  }
  0xb1   :  { %2033 = vmatprep.subr.bf16.mxu0 %v4738_v34  ;;  %2051 = vmatprep.mubr.bf16.mxu0 %v5333_v56  ;;  %v5361_v34 = vcombine.low %v61_v55, %v65_v20  ;;  %v4801_v35 = vld [vmem:[#allocation4 + $0x46c] ss:$16 sps:$4 sm:$0xff]  }
  0xb2   :  { %2197 = vmatprep.mubr.bf16.mxu1 %v5177_v57  ;;  %v4757_v57 = vld [vmem:[#allocation4 + $0x348] ss:$16 sps:$4 sm:$0xff]  }
  0xb3   :  { %2180 = vmatpush1.bf16.msra.mxu1 %v4739_v37  ;;  %v4804_v37 = vld [vmem:[#allocation4 + $0x48c] ss:$16 sps:$4 sm:$0xff]  }
  0xb4   :  { %2034 = vmatpush1.bf16.msra.mxu0 %v4736_v36  ;;  %2181 = vmatprep.subr.bf16.mxu1 %v4747_v40  ;;  %v4799_v36 = vld [vmem:[#allocation4 + $0x468] ss:$16 sps:$4 sm:$0xff]   ;;  %v5375_v40 = vcombine.low %v69_v30, %v73_v33 }
  0xb5   :  { %2035 = vmatprep.subr.bf16.mxu0 %v4744_v39  ;;  %v81_v39 = vld [vmem:[%s6162_s0 + $0xf8] sm:$0xff]  ;;  %v4912_v20 = vld [vmem:[%s6165_s3 + $0x84] ss:$8 sps:$4 sm:$0xff]  }
  0xb6   :  { %v4907_v55 = vld [vmem:[%s6165_s3 + $0x70] ss:$8 sps:$4 sm:$0xff]  }
  0xb7   :  { %2182 = vmatpush1.bf16.msra.mxu1 %v4745_v42  ;;  %v4807_v42 = vld [vmem:[#allocation4 + $0x4ac] ss:$16 sps:$4 sm:$0xff]  }
  0xb8   :  { %2036 = vmatpush1.bf16.msra.mxu0 %v4742_v41  ;;  %2183 = vmatprep.subr.bf16.mxu1 %v4753_v47  ;;  %v4810_v47 = vld [vmem:[#allocation4 + $0x4cc] ss:$16 sps:$4 sm:$0xff]  }
  0xb9   :  { %2037 = vmatprep.subr.bf16.mxu0 %v4750_v46  ;;  %v4805_v46 = vld [vmem:[#allocation4 + $0x4a8] ss:$16 sps:$4 sm:$0xff]  }
  0xbb   :  { %2184 = vmatpush1.bf16.msra.mxu1 %v4751_v62  ;;  %v4813_v62 = vld [vmem:[#allocation4 + $0x4ec] ss:$16 sps:$4 sm:$0xff]  }
  0xbc   :  { %2038 = vmatpush1.bf16.msra.mxu0 %v4748_v48  ;;  %2185 = vmatprep.subr.bf16.mxu1 %v4759_v50  ;;  %v4808_v48 = vld [vmem:[#allocation4 + $0x4c8] ss:$16 sps:$4 sm:$0xff]  }
  0xbd   :  { %2039 = vmatprep.subr.bf16.mxu0 %v4756_v49  ;;  %v4888_v49 = vld [vmem:[%s6165_s3 + $0x4] ss:$8 sps:$4 sm:$0xff]   ;;  %v4891_v50 = vld [vmem:[%s6165_s3 + $0x14] ss:$8 sps:$4 sm:$0xff]  }
  0xbf   :  { %2186 = vmatpush1.bf16.msra.mxu1 %v4757_v57  ;;  %v4894_v57 = vld [vmem:[%s6165_s3 + $0x24] ss:$8 sps:$4 sm:$0xff]  }
  0xc0   :  { %2040 = vmatpush1.bf16.msra.mxu0 %v4754_v52  ;;  %2187 = vmatprep.subr.bf16.mxu1 %v4765_v54  ;;  %v4816_v52 = vld [vmem:[#allocation4 + $0x50c] ss:$16 sps:$4 sm:$0xff]  }
  0xc1   :  { %2041 = vmatprep.subr.bf16.mxu0 %v4762_v53  ;;  %v4814_v53 = vld [vmem:[#allocation4 + $0x508] ss:$16 sps:$4 sm:$0xff]  }
  0xc2   :  { %v4892_v54 = vld [vmem:[%s6165_s3 + $0x20] ss:$8 sps:$4 sm:$0xff]  }
  0xc3   :  { %2188 = vmatpush1.bf16.msra.mxu1 %v4763_v60  ;;  %v4817_v60 = vld [vmem:[#allocation4 + $0x528] ss:$16 sps:$4 sm:$0xff]  }
  0xc4   :  { %2042 = vmatpush1.bf16.msra.mxu0 %v4760_v58  ;;  %2189 = vmatprep.subr.bf16.mxu1 %v4771_v1  ;;  %v4897_v58 = vld [vmem:[%s6165_s3 + $0x34] ss:$8 sps:$4 sm:$0xff]   ;;  %v4895_v1 = vld [vmem:[%s6165_s3 + $0x30] ss:$8 sps:$4 sm:$0xff]  }
  0xc5   :  { %2043 = vmatprep.subr.bf16.mxu0 %v4768_v0  ;;  %v4822_v0 = vld [vmem:[#allocation4 + $0x54c] ss:$16 sps:$4 sm:$0xff]  }
  0xc7   :  { %2190 = vmatpush1.bf16.msra.mxu1 %v4769_v3  ;;  %v4820_v3 = vld [vmem:[#allocation4 + $0x548] ss:$16 sps:$4 sm:$0xff]  }
  0xc8   :  { %2044 = vmatpush1.bf16.msra.mxu0 %v4766_v2  ;;  %2191 = vmatprep.subr.bf16.mxu1 %v4777_v10  ;;  %v4900_v2 = vld [vmem:[%s6165_s3 + $0x44] ss:$8 sps:$4 sm:$0xff]   ;;  %v4898_v10 = vld [vmem:[%s6165_s3 + $0x40] ss:$8 sps:$4 sm:$0xff]  }
  0xc9   :  { %2045 = vmatprep.subr.bf16.mxu0 %v4774_v5  ;;  %v4825_v5 = vld [vmem:[#allocation4 + $0x56c] ss:$16 sps:$4 sm:$0xff]  }
  0xcb   :  { %2192 = vmatpush1.bf16.msra.mxu1 %v4775_v8  ;;  %v4823_v8 = vld [vmem:[#allocation4 + $0x568] ss:$16 sps:$4 sm:$0xff]  }
  0xcc   :  { %2046 = vmatpush1.bf16.msra.mxu0 %v4772_v7  ;;  %2193 = vmatprep.subr.bf16.mxu1 %v4783_v12  ;;  %v4903_v7 = vld [vmem:[%s6165_s3 + $0x54] ss:$8 sps:$4 sm:$0xff]   ;;  %v4901_v12 = vld [vmem:[%s6165_s3 + $0x50] ss:$8 sps:$4 sm:$0xff]  }
  0xcd   :  { %2047 = vmatprep.subr.bf16.mxu0 %v4780_v9  ;;  %v4828_v9 = vld [vmem:[#allocation4 + $0x58c] ss:$16 sps:$4 sm:$0xff]  }
  0xcf   :  { %2194 = vmatpush1.bf16.msra.mxu1 %v4781_v14  ;;  %v4826_v14 = vld [vmem:[#allocation4 + $0x588] ss:$16 sps:$4 sm:$0xff]  }
  0xd0   :  { %2048 = vmatpush1.bf16.msra.mxu0 %v4778_v27  ;;  %2195 = vmatprep.subr.bf16.mxu1 %v4789_v16  ;;  %v4906_v27 = vld [vmem:[%s6165_s3 + $0x64] ss:$8 sps:$4 sm:$0xff]   ;;  %v4904_v16 = vld [vmem:[%s6165_s3 + $0x60] ss:$8 sps:$4 sm:$0xff]  }
  0xd1   :  { %2049 = vmatprep.subr.bf16.mxu0 %v4786_v15  ;;  %v4831_v15 = vld [vmem:[#allocation4 + $0x5ac] ss:$16 sps:$4 sm:$0xff]  }
  0xd3   :  { %2196 = vmatpush1.bf16.msra.mxu1 %v4787_v28  ;;  %v4829_v28 = vld [vmem:[#allocation4 + $0x5a8] ss:$16 sps:$4 sm:$0xff]  }
  0xd4   :  { %2050 = vmatpush1.bf16.msra.mxu0 %v4784_v17  ;;  %2238 = vmatprep.subr.bf16.mxu1 %v4792_v19  ;;  %v4909_v17 = vld [vmem:[%s6165_s3 + $0x74] ss:$8 sps:$4 sm:$0xff]  }
  0xd5   :  { %2828 = vmatprep.subr.bf16.mxu0 %v4888_v49  ;;  %v4834_v19 = vld [vmem:[#allocation4 + $0x5cc] ss:$16 sps:$4 sm:$0xff]  }
  0xd6   :  { %2198 = vmatmul.mubr.bf16.vlgmr.msra.gmra.mrb[16].mxu1 %v5183_v11  ;;  %v5363_v11 = vcombine.high %v69_v30, %v73_v33  ;;  %v4835_v30 = vld [vmem:[#allocation4 + $0x5e8] ss:$16 sps:$4 sm:$0xff]   ;;  %v4840_v33 = vld [vmem:[#allocation4 + $0x60c] ss:$16 sps:$4 sm:$0xff]  }
  0xd7   :  { %2052 = vmatmul.mubr.bf16.vlgmr.msra.gmra.mrb[0].mxu0 %v5347_v38  ;;  %2239 = vmatpush1.bf16.msra.mxu1 %v4790_v21  ;;  %v4832_v21 = vld [vmem:[#allocation4 + $0x5c8] ss:$16 sps:$4 sm:$0xff]   ;;  %v4852_v49 = vld [vmem:[#allocation4 + $0x68c] ss:$16 sps:$4 sm:$0xff]  }
  0xd8   :  { %2061 = vmatprep.mubr.bf16.mxu0 %v5349_v24  ;;  %2240 = vmatprep.subr.bf16.mxu1 %v4795_v23  ;;  %v4837_v23 = vld [vmem:[#allocation4 + $0x5ec] ss:$16 sps:$4 sm:$0xff]  }
  0xd9   :  { %2207 = vmatprep.mubr.bf16.mxu1 %v5203_v29  ;;  %v77_v29 = vld [vmem:[%s6162_s0 + $0xd8] sm:$0xff] }
  0xda   :  { %v5377_v41 = vcombine.high %v77_v29, %v81_v39 }
  0xdb   :  { %2241 = vmatpush1.bf16.msra.mxu1 %v4793_v25  ;;  %v4910_v25 = vld [vmem:[%s6165_s3 + $0x80] ss:$8 sps:$4 sm:$0xff]  }
  0xdc   :  { %2242 = vmatprep.subr.bf16.mxu1 %v4798_v26  ;;  %v4915_v26 = vld [vmem:[%s6165_s3 + $0x94] ss:$8 sps:$4 sm:$0xff]  }
  0xde   :  { %2208 = vmatmul.mubr.bf16.gmra.mrb[20].mxu1 %v5205_v31  ;;  %v4802_v31 = vld [vmem:[#allocation4 + $0x488] ss:$16 sps:$4 sm:$0xff]  }
  0xdf   :  { %2062 = vmatmul.mubr.bf16.gmra.mrb[4].mxu0 %v5361_v34  ;;  %2243 = vmatpush1.bf16.msra.mxu1 %v4796_v43  ;;  %v4913_v43 = vld [vmem:[%s6165_s3 + $0x90] ss:$8 sps:$4 sm:$0xff]  }
  0xe0   :  { %2071 = vmatprep.mubr.bf16.mxu0 %v5363_v11  ;;  %2244 = vmatprep.subr.bf16.mxu1 %v4801_v35  ;;  %v4918_v35 = vld [vmem:[%s6165_s3 + $0xa4] ss:$8 sps:$4 sm:$0xff]  }
  0xe1   :  { %2217 = vmatprep.mubr.bf16.mxu1 %v5227_v44  ;;  %v5383_v44 = vcombine.low %v77_v29, %v81_v39  ;;  %v4916_v29 = vld [vmem:[%s6165_s3 + $0xa0] ss:$8 sps:$4 sm:$0xff]   ;;  %v4921_v39 = vld [vmem:[%s6165_s3 + $0xb4] ss:$8 sps:$4 sm:$0xff]  }
  0xe3   :  { %2245 = vmatpush1.bf16.msra.mxu1 %v4799_v36  ;;  %v4838_v36 = vld [vmem:[#allocation4 + $0x608] ss:$16 sps:$4 sm:$0xff]  }
  0xe4   :  { %2246 = vmatprep.subr.bf16.mxu1 %v4804_v37  ;;  %v4843_v37 = vld [vmem:[#allocation4 + $0x62c] ss:$16 sps:$4 sm:$0xff]  }
  0xe6   :  { %2218 = vmatmul.mubr.bf16.gmra.mrb[24].mxu1 %v5229_v45  ;;  %v4886_v45 = vld [vmem:[%s6165_s3] ss:$8 sps:$4 sm:$0xff]  }
  0xe7   :  { %2072 = vmatmul.mubr.bf16.gmra.mrb[8].mxu0 %v5375_v40  ;;  %2247 = vmatpush1.bf16.msra.mxu1 %v4802_v31  ;;  %v4841_v31 = vld [vmem:[#allocation4 + $0x628] ss:$16 sps:$4 sm:$0xff]  }
  0xe8   :  { %2081 = vmatprep.mubr.bf16.mxu0 %v5377_v41  ;;  %2248 = vmatprep.subr.bf16.mxu1 %v4807_v42  ;;  %v4846_v42 = vld [vmem:[#allocation4 + $0x64c] ss:$16 sps:$4 sm:$0xff]  }
  0xe9   :  { %2227 = vmatprep.mubr.bf16.mxu1 %v5249_v59  ;;  %v4811_v59 = vld [vmem:[#allocation4 + $0x4e8] ss:$16 sps:$4 sm:$0xff]   ;;  %2829 = vmatpush1.bf16.msra.mxu0 %v4886_v45 }
  0xea   :  { %2830 = vmatprep.subr.bf16.mxu0 %v4891_v50  ;;  %v4847_v45 = vld [vmem:[#allocation4 + $0x668] ss:$16 sps:$4 sm:$0xff]  }
  0xeb   :  { %2249 = vmatpush1.bf16.msra.mxu1 %v4805_v46  ;;  %v4919_v46 = vld [vmem:[%s6165_s3 + $0xb0] ss:$8 sps:$4 sm:$0xff]  }
  0xec   :  { %2250 = vmatprep.subr.bf16.mxu1 %v4810_v47  ;;  %v4844_v47 = vld [vmem:[#allocation4 + $0x648] ss:$16 sps:$4 sm:$0xff]  }
  0xed   :  { %v4850_v50 = vld [vmem:[#allocation4 + $0x688] ss:$16 sps:$4 sm:$0xff]  }
  0xee   :  { %2228 = vmatmul.mubr.bf16.gmra.mrb[28].mxu1 %v5254_v63  ;;  %v4889_v63 = vld [vmem:[%s6165_s3 + $0x10] ss:$8 sps:$4 sm:$0xff]  }
  0xef   :  { %2082 = vmatmul.mubr.bf16.gmra.mrb[12].mxu0 %v5383_v44  ;;  %2251 = vmatpush1.bf16.msra.mxu1 %v4808_v48  ;;  %v4849_v48 = vld [vmem:[#allocation4 + $0x66c] ss:$16 sps:$4 sm:$0xff]  }
  0xf0   :  { %2270 = vmatprep.mubr.bf16.mxu1 %v5271_v6  ;;  %2252 = vmatprep.subr.bf16.mxu1 %v4813_v62  ;;  %v4819_v6 = vld [vmem:[#allocation4 + $0x52c] ss:$16 sps:$4 sm:$0xff]  }
  0xf1   :  { %2831 = vmatpush1.bf16.msra.mxu0 %v4889_v63  ;;  %v4927_v62 = vld [vmem:[%s6165_s3 + $0xd4] ss:$8 sps:$4 sm:$0xff]  }
  0xf2   :  { %2832 = vmatprep.subr.bf16.mxu0 %v4894_v57 }
  0xf3   :  { %2253 = vmatpush1.bf16.msra.mxu1 %v4811_v59  ;;  %v4925_v59 = vld [vmem:[%s6165_s3 + $0xd0] ss:$8 sps:$4 sm:$0xff]  }
  0xf4   :  { %2254 = vmatprep.subr.bf16.mxu1 %v4816_v52  ;;  %v4853_v52 = vld [vmem:[#allocation4 + $0x6a8] ss:$16 sps:$4 sm:$0xff]  }
  0xf5   :  { %2833 = vmatpush1.bf16.msra.mxu0 %v4892_v54  ;;  %v4856_v54 = vld [vmem:[#allocation4 + $0x6c8] ss:$16 sps:$4 sm:$0xff]  }
  0xf6   :  { %2834 = vmatprep.subr.bf16.mxu0 %v4897_v58 }
  0xf7   :  { %2255 = vmatpush1.bf16.msra.mxu1 %v4814_v53  ;;  %v4930_v53 = vld [vmem:[%s6165_s3 + $0xe4] ss:$8 sps:$4 sm:$0xff]  }
  0xf8   :  { %2256 = vmatprep.subr.bf16.mxu1 %v4819_v6 }
  0xf9   :  { %2835 = vmatpush1.bf16.msra.mxu0 %v4895_v1  ;;  %v4931_v1 = vld [vmem:[%s6165_s3 + $0xf0] ss:$8 sps:$4 sm:$0xff]  }
  0xfa   :  { %2836 = vmatprep.subr.bf16.mxu0 %v4900_v2  ;;  %v4864_v2 = vld [vmem:[#allocation4 + $0x70c] ss:$16 sps:$4 sm:$0xff]  }
  0xfb   :  { %2257 = vmatpush1.bf16.msra.mxu1 %v4817_v60  ;;  %v4933_v60 = vld [vmem:[%s6165_s3 + $0xf4] ss:$8 sps:$4 sm:$0xff]  }
  0xfc   :  { %2258 = vmatprep.subr.bf16.mxu1 %v4822_v0  ;;  %v4859_v0 = vld [vmem:[#allocation4 + $0x6e8] ss:$16 sps:$4 sm:$0xff]  }
  0xfd   :  { %2837 = vmatpush1.bf16.msra.mxu0 %v4898_v10 }
  0xfe   :  { %2838 = vmatprep.subr.bf16.mxu0 %v4903_v7  ;;  %v4867_v7 = vld [vmem:[#allocation4 + $0x72c] ss:$16 sps:$4 sm:$0xff]  }
  0xff   :  { %2259 = vmatpush1.bf16.msra.mxu1 %v4820_v3 }
 0x100   :  { %2260 = vmatprep.subr.bf16.mxu1 %v4825_v5 }
 0x101   :  { %2839 = vmatpush1.bf16.msra.mxu0 %v4901_v12 }
 0x102   :  { %2840 = vmatprep.subr.bf16.mxu0 %v4906_v27 }
 0x103   :  { %2261 = vmatpush1.bf16.msra.mxu1 %v4823_v8 }
 0x104   :  { %2262 = vmatprep.subr.bf16.mxu1 %v4828_v9  ;;  %v4870_v9 = vld [vmem:[#allocation4 + $0x74c] ss:$16 sps:$4 sm:$0xff]  }
 0x105   :  { %2841 = vmatpush1.bf16.msra.mxu0 %v4904_v16  ;;  %v4873_v16 = vld [vmem:[#allocation4 + $0x76c] ss:$16 sps:$4 sm:$0xff]  }
 0x106   :  { %2842 = vmatprep.subr.bf16.mxu0 %v4909_v17 }
 0x107   :  { %2263 = vmatpush1.bf16.msra.mxu1 %v4826_v14  ;;  %v4868_v14 = vld [vmem:[#allocation4 + $0x748] ss:$16 sps:$4 sm:$0xff]  }
 0x108   :  { %2264 = vmatprep.subr.bf16.mxu1 %v4831_v15 }
 0x109   :  { %2843 = vmatpush1.bf16.msra.mxu0 %v4907_v55 }
 0x10a   :  { %2844 = vmatprep.subr.bf16.mxu0 %v4912_v20 }
 0x10b   :  { %2265 = vmatpush1.bf16.msra.mxu1 %v4829_v28  ;;  %v4871_v28 = vld [vmem:[#allocation4 + $0x768] ss:$16 sps:$4 sm:$0xff]  }
 0x10c   :  { %2266 = vmatprep.subr.bf16.mxu1 %v4834_v19  ;;  %v4876_v19 = vld [vmem:[#allocation4 + $0x78c] ss:$16 sps:$4 sm:$0xff]  }
 0x10d   :  { %2845 = vmatpush1.bf16.msra.mxu0 %v4910_v25  ;;  %v4879_v25 = vld [vmem:[#allocation4 + $0x7ac] ss:$16 sps:$4 sm:$0xff]  }
 0x10e   :  { %2846 = vmatprep.subr.bf16.mxu0 %v4915_v26 }
 0x10f   :  { %2267 = vmatpush1.bf16.msra.mxu1 %v4832_v21  ;;  %v4874_v21 = vld [vmem:[#allocation4 + $0x788] ss:$16 sps:$4 sm:$0xff]  }
 0x110   :  { %2268 = vmatprep.subr.bf16.mxu1 %v4837_v23 }
 0x111   :  { %2847 = vmatpush1.bf16.msra.mxu0 %v4913_v43  ;;  %v4880_v43 = vld [vmem:[#allocation4 + $0x7c8] ss:$16 sps:$4 sm:$0xff]  }
 0x112   :  { %2848 = vmatprep.subr.bf16.mxu0 %v4918_v35  ;;  %v4885_v35 = vld [vmem:[#allocation4 + $0x7ec] ss:$16 sps:$4 sm:$0xff]  }
 0x113   :  { %2269 = vmatpush1.bf16.msra.mxu1 %v4835_v30  ;;  %v4877_v30 = vld [vmem:[#allocation4 + $0x7a8] ss:$16 sps:$4 sm:$0xff]  }
 0x114   :  { %2311 = vmatprep.subr.bf16.mxu1 %v4840_v33  ;;  %v4882_v33 = vld [vmem:[#allocation4 + $0x7cc] ss:$16 sps:$4 sm:$0xff]  }
 0x115   :  { %2849 = vmatpush1.bf16.msra.mxu0 %v4916_v29  ;;  %v340_v29 = vlaneseq }
 0x116   :  { %2271 = vmatmul.mubr.bf16.vlgmr.msra.gmra.mrb[16].mxu1 %v5280_v51  ;;  %2850 = vmatprep.subr.bf16.mxu0 %v4921_v39  ;;  %v4924_v51 = vld [vmem:[%s6165_s3 + $0xc4] ss:$8 sps:$4 sm:$0xff]  }
 0x117   :  { %2312 = vmatpush1.bf16.msra.mxu1 %v4838_v36  ;;  %2280 = vmatprep.mubr.bf16.mxu1 %v5285_v61  ;;  %v4922_v61 = vld [vmem:[%s6165_s3 + $0xc0] ss:$8 sps:$4 sm:$0xff]   ;;  %v4936_v36 = vld [vmem:[%s6165_s3 + $0x104] ss:$8 sps:$4 sm:$0xff]   ;;  %v5535_v39 = vshrl.u32 %v340_v29, 7 }
 0x118   :  { %2313 = vmatprep.subr.bf16.mxu1 %v4843_v37  ;;  %v4883_v37 = vld [vmem:[#allocation4 + $0x7e8] ss:$16 sps:$4 sm:$0xff]  }
 0x119   :  { %2851 = vmatpush1.bf16.msra.mxu0 %v4919_v46 }
 0x11a   :  { %2852 = vmatprep.subr.bf16.mxu0 %v4924_v51 }
 0x11b   :  { %2314 = vmatpush1.bf16.msra.mxu1 %v4841_v31  ;;  %v5538_v31 = vsub.s32 0, %v5535_v39 }
 0x11c   :  { %2315 = vmatprep.subr.bf16.mxu1 %v4846_v42 }
 0x11d   :  { %2853 = vmatpush1.bf16.msra.mxu0 %v4922_v61 }
 0x11e   :  { %2281 = vmatmul.mubr.bf16.gmra.mrb[20].mxu1 %v5291_v4  ;;  %2854 = vmatprep.subr.bf16.mxu0 %v4927_v62  ;;  %v4855_v4 = vld [vmem:[#allocation4 + $0x6ac] ss:$16 sps:$4 sm:$0xff]  }
 0x11f   :  { %2316 = vmatpush1.bf16.msra.mxu1 %v4844_v47  ;;  %2290 = vmatprep.mubr.bf16.mxu1 %v5299_v13  ;;  %v4858_v13 = vld [vmem:[#allocation4 + $0x6cc] ss:$16 sps:$4 sm:$0xff]  }
 0x120   :  { %2317 = vmatprep.subr.bf16.mxu1 %v4849_v48 }
 0x121   :  { %2855 = vmatpush1.bf16.msra.mxu0 %v4925_v59 }
 0x122   :  { %2856 = vmatprep.subr.bf16.mxu0 %v4930_v53 }
 0x123   :  { %2318 = vmatpush1.bf16.msra.mxu1 %v4847_v45 }
 0x124   :  { %2319 = vmatprep.subr.bf16.mxu1 %v4852_v49 }
 0x126   :  { %2291 = vmatmul.mubr.bf16.gmra.mrb[24].mxu1 %v5308_v18  ;;  %v4928_v18 = vld [vmem:[%s6165_s3 + $0xe0] ss:$8 sps:$4 sm:$0xff]  }
 0x127   :  { %2320 = vmatpush1.bf16.msra.mxu1 %v4850_v50  ;;  %2300 = vmatprep.mubr.bf16.mxu1 %v5313_v22  ;;  %v4861_v22 = vld [vmem:[#allocation4 + $0x6ec] ss:$16 sps:$4 sm:$0xff]  }
 0x128   :  { %2321 = vmatprep.subr.bf16.mxu1 %v4855_v4  ;;  %2857 = vmatpush1.bf16.msra.mxu0 %v4928_v18 }
 0x129   :  { %v5478_v63 = vpop.f32.mrb[0].mxu1  ;;  %2858 = vmatprep.subr.bf16.mxu0 %v4933_v60 }
 0x12a   :  { %v5480_v57 = vpop.f32.mrb[1].mxu1 }
 0x12b   :  { %v5485_v6 = vpop.f32.mrb[2].mxu1  ;;  %2322 = vmatpush1.bf16.msra.mxu1 %v4853_v52 }
 0x12c   :  { %v5490_v58 = vpop.f32.mrb[3].mxu1  ;;  %2323 = vmatprep.subr.bf16.mxu1 %v4858_v13  ;;  %2859 = vmatpush1.bf16.msra.mxu0 %v4931_v1  ;;  %v4939_v1 = vld [vmem:[%s6165_s3 + $0x114] ss:$8 sps:$4 sm:$0xff]  }
 0x12d   :  { %2901 = vmatprep.subr.bf16.mxu0 %v4936_v36  ;;  %v4940_v36 = vld [vmem:[%s6165_s3 + $0x120] ss:$8 sps:$4 sm:$0xff]  }
 0x12e   :  { %2301 = vmatmul.mubr.bf16.gmra.mrb[28].mxu1 %v5319_v32  ;;  %v4862_v32 = vld [vmem:[#allocation4 + $0x708] ss:$16 sps:$4 sm:$0xff]  }
 0x12f   :  { %2324 = vmatpush1.bf16.msra.mxu1 %v4856_v54  ;;  %2343 = vmatprep.mubr.bf16.mxu1 %v5333_v56  ;;  %v4865_v56 = vld [vmem:[#allocation4 + $0x728] ss:$16 sps:$4 sm:$0xff]  }
 0x130   :  { %2325 = vmatprep.subr.bf16.mxu1 %v4861_v22 }
 0x131   :  { %v5500_v3 = vpop.f32.mrb[4].mxu1 }
 0x132   :  { %v5502_v5 = vpop.f32.mrb[5].mxu1 }
 0x133   :  { %2326 = vmatpush1.bf16.msra.mxu1 %v4859_v0  ;;  %v5504_v10 = vpop.f32.mrb[6].mxu1 }
 0x134   :  { %2327 = vmatprep.subr.bf16.mxu1 %v4864_v2  ;;  %v5506_v8 = vpop.f32.mrb[7].mxu1 }
 0x137   :  { %2328 = vmatpush1.bf16.msra.mxu1 %v4862_v32 }
 0x138   :  { %2329 = vmatprep.subr.bf16.mxu1 %v4867_v7 }
 0x139   :  { %v5508_v12 = vpop.f32.mrb[8].mxu1 }
 0x13a   :  { %v5510_v27 = vpop.f32.mrb[9].mxu1 }
 0x13b   :  { %2330 = vmatpush1.bf16.msra.mxu1 %v4865_v56  ;;  %v5512_v15 = vpop.f32.mrb[10].mxu1 }
 0x13c   :  { %2331 = vmatprep.subr.bf16.mxu1 %v4870_v9  ;;  %v5514_v17 = vpop.f32.mrb[11].mxu1 }
 0x13f   :  { %2332 = vmatpush1.bf16.msra.mxu1 %v4868_v14 }
 0x140   :  { %2333 = vmatprep.subr.bf16.mxu1 %v4873_v16 }
 0x141   :  { %v5516_v55 = vpop.f32.mrb[12].mxu1 }
 0x142   :  { %v5518_v20 = vpop.f32.mrb[13].mxu1 }
 0x143   :  { %2334 = vmatpush1.bf16.msra.mxu1 %v4871_v28  ;;  %v5520_v23 = vpop.f32.mrb[14].mxu1 }
 0x144   :  { %2335 = vmatprep.subr.bf16.mxu1 %v4876_v19  ;;  %v5522_v26 = vpop.f32.mrb[15].mxu1 }
 0x147   :  { %2336 = vmatpush1.bf16.msra.mxu1 %v4874_v21 }
 0x148   :  { %2337 = vmatprep.subr.bf16.mxu1 %v4879_v25 }
 0x14b   :  { %2338 = vmatpush1.bf16.msra.mxu1 %v4877_v30 }
 0x14c   :  { %2339 = vmatprep.subr.bf16.mxu1 %v4882_v33 }
 0x14f   :  { %2340 = vmatpush1.bf16.msra.mxu1 %v4880_v43 }
 0x150   :  { %2341 = vmatprep.subr.bf16.mxu1 %v4885_v35 }
 0x153   :  { %2342 = vmatpush1.bf16.msra.mxu1 %v4883_v37 }
 0x156   :  { %2344 = vmatmul.mubr.bf16.vlgmr.msra.gmra.mrb[16].mxu1 %v5347_v38  ;;  %v5543_v38 = vld [vmem:[%s6164_s2] sm:$0xf] }
 0x157   :  { %2353 = vmatprep.mubr.bf16.mxu1 %v5349_v24  ;;  %v5546_v24 = vsub.s32 1, %v5535_v39 }
 0x15e   :  { %2354 = vmatmul.mubr.bf16.gmra.mrb[20].mxu1 %v5361_v34  ;;  %v5550_v34 = vrot.slane %v5543_v38, %v5538_v31 }
 0x15f   :  { %2363 = vmatprep.mubr.bf16.mxu1 %v5363_v11  ;;  %v5554_v11 = vrot.slane %v5543_v38, %v5546_v24 }
 0x160   :  { %v1839_v42 = vadd.f32 %v5485_v6, %v5550_v34  ;;  %v1849_v22 = vadd.f32 %v5504_v10, %v5550_v34  ;;  %v4937_v10 = vld [vmem:[%s6165_s3 + $0x110] ss:$8 sps:$4 sm:$0xff]   ;;  %v1855_v21 = vadd.f32 %v5508_v12, %v5550_v34  ;;  %v1859_v37 = vadd.f32 %v5512_v15, %v5550_v34  ;;  %v4945_v12 = vld [vmem:[%s6165_s3 + $0x134] ss:$8 sps:$4 sm:$0xff]  }
 0x161   :  { %v1841_v47 = vadd.f32 %v5490_v58, %v5554_v11  ;;  %v1847_v53 = vadd.f32 %v5502_v5, %v5554_v11  ;;  %v4934_v58 = vld [vmem:[%s6165_s3 + $0x100] ss:$8 sps:$4 sm:$0xff]   ;;  %v1851_v2 = vadd.f32 %v5506_v8, %v5554_v11  ;;  %v4942_v8 = vld [vmem:[%s6165_s3 + $0x124] ss:$8 sps:$4 sm:$0xff]   ;;  %v1857_v30 = vadd.f32 %v5510_v27, %v5554_v11  ;;  %v4943_v15 = vld [vmem:[%s6165_s3 + $0x130] ss:$8 sps:$4 sm:$0xff]  }
 0x162   :  { %v1861_v27 = vadd.f32 %v5514_v17, %v5554_v11  ;;  %v4948_v17 = vld [vmem:[%s6165_s3 + $0x144] ss:$8 sps:$4 sm:$0xff]  }
 0x166   :  { %2364 = vmatmul.mubr.bf16.gmra.mrb[24].mxu1 %v5375_v40  ;;  %v1835_v40 = vadd.f32 %v5478_v63, %v5550_v34  ;;  %v1845_v63 = vadd.f32 %v5500_v3, %v5550_v34 }
 0x167   :  { %2373 = vmatprep.mubr.bf16.mxu1 %v5377_v41  ;;  %v1837_v41 = vadd.f32 %v5480_v57, %v5554_v11 }
 0x16e   :  { %2374 = vmatmul.mubr.bf16.gmra.mrb[28].mxu1 %v5383_v44 }
 0x1aa   :  { %v2053_v44 = vpop.f32.mrb[0].mxu0 }
 0x1ab   :  { %v4336_v46 = vadd.f32 %v2053_v44, %v1835_v40  ;;  %v2055_v51 = vpop.f32.mrb[1].mxu0 }
 0x1ac   :  { %v4338_v48 = vadd.f32 %v2055_v51, %v1837_v41  ;;  %v2057_v61 = vpop.f32.mrb[2].mxu0 }
 0x1ad   :  { %v2384_v62 = vmax.f32 %v4336_v46, 0.0  ;;  %v4340_v45 = vadd.f32 %v2057_v61, %v1839_v42  ;;  %v2059_v49 = vpop.f32.mrb[3].mxu0 }
 0x1ae   :  { %v2385_v59 = vmax.f32 %v4338_v48, 0.0  ;;  %v4342_v50 = vadd.f32 %v2059_v49, %v1841_v47 }
 0x1af   :  { %v2388_v4 = vmax.f32 %v4340_v45, 0.0 }
 0x1b0   :  { %v5564_v52 = vpack.c.bf16 %v2385_v59, %v2384_v62  ;;  %v2389_v13 = vmax.f32 %v4342_v50, 0.0 }
 0x1b1   :  { %v2416_v57 = vpack.c.bf16 %v2388_v4, %v2384_v62 }
 0x1b2   :  { %v2417_v6 = vpack.c.bf16 %v2389_v13, %v2385_v59  ;;  %v5570_v54 = vpack.c.bf16 %v2389_v13, %v2388_v4  ;;  %v2063_v18 = vpop.f32.mrb[4].mxu0  ;;  %v1865_v59 = vadd.f32 %v5516_v55, %v5550_v34  ;;  %v1867_v4 = vadd.f32 %v5518_v20, %v5554_v11  ;;  %v4951_v55 = vld [vmem:[%s6165_s3 + $0x154] ss:$8 sps:$4 sm:$0xff]  }
 0x1b3   :  { %v4344_v60 = vadd.f32 %v2063_v18, %v1845_v63  ;;  %v2065_v0 = vpop.f32.mrb[5].mxu0  ;;  %v1871_v20 = vadd.f32 %v5522_v26, %v5554_v11  ;;  %v4954_v26 = vld [vmem:[%s6165_s3 + $0x164] ss:$8 sps:$4 sm:$0xff]  }
 0x1b4   :  { %v4346_v3 = vadd.f32 %v2065_v0, %v1847_v53  ;;  %v2067_v5 = vpop.f32.mrb[6].mxu0  ;;  %2860 = vmatprep.mubr.bf16.mxu0 %v2417_v6  ;;  %v4946_v53 = vld [vmem:[%s6165_s3 + $0x140] ss:$8 sps:$4 sm:$0xff]   ;;  %v1869_v6 = vadd.f32 %v5520_v23, %v5550_v34  ;;  %v4949_v23 = vld [vmem:[%s6165_s3 + $0x150] ss:$8 sps:$4 sm:$0xff]  }
 0x1b5   :  { %v2392_v32 = vmax.f32 %v4344_v60, 0.0  ;;  %v4348_v7 = vadd.f32 %v2067_v5, %v1849_v22  ;;  %v2069_v56 = vpop.f32.mrb[7].mxu0  ;;  %2861 = vmatmul.mubr.bf16.vlgmr.msra.gmra.mrb[16].mxu0 %v2416_v57 }
 0x1b6   :  { %v2393_v9 = vmax.f32 %v4346_v3, 0.0  ;;  %v4350_v14 = vadd.f32 %v2069_v56, %v1851_v2  ;;  %2902 = vmatpush1.bf16.msra.mxu0 %v4934_v58 }
 0x1b7   :  { %v2396_v16 = vmax.f32 %v4348_v7, 0.0  ;;  %2903 = vmatprep.subr.bf16.mxu0 %v4939_v1 }
 0x1b8   :  { %v5588_v28 = vpack.c.bf16 %v2393_v9, %v2392_v32  ;;  %v2397_v19 = vmax.f32 %v4350_v14, 0.0  ;;  %v4952_v14 = vld [vmem:[%s6165_s3 + $0x160] ss:$8 sps:$4 sm:$0xff]  }
 0x1b9   :  { %v2420_v25 = vpack.c.bf16 %v2396_v16, %v2392_v32 }
 0x1ba   :  { %v2421_v33 = vpack.c.bf16 %v2397_v19, %v2393_v9  ;;  %v5594_v43 = vpack.c.bf16 %v2397_v19, %v2396_v16  ;;  %v2073_v35 = vpop.f32.mrb[8].mxu0  ;;  %2904 = vmatpush1.bf16.msra.mxu0 %v4937_v10  ;;  %v4957_v10 = vld [vmem:[%s6165_s3 + $0x174] ss:$8 sps:$4 sm:$0xff]   ;;  %v4955_v16 = vld [vmem:[%s6165_s3 + $0x170] ss:$8 sps:$4 sm:$0xff]  }
 0x1bb   :  { %v4352_v40 = vadd.f32 %v2073_v35, %v1855_v21  ;;  %v2075_v41 = vpop.f32.mrb[9].mxu0  ;;  %2905 = vmatprep.subr.bf16.mxu0 %v4942_v8  ;;  %v4960_v8 = vld [vmem:[%s6165_s3 + $0x184] ss:$8 sps:$4 sm:$0xff]   ;;  %v4958_v19 = vld [vmem:[%s6165_s3 + $0x180] ss:$8 sps:$4 sm:$0xff]  }
 0x1bc   :  { %v4354_v44 = vadd.f32 %v2075_v41, %v1857_v30  ;;  %v2077_v42 = vpop.f32.mrb[10].mxu0  ;;  %2870 = vmatprep.mubr.bf16.mxu0 %v2421_v33  ;;  %v4963_v21 = vld [vmem:[%s6165_s3 + $0x194] ss:$8 sps:$4 sm:$0xff]   ;;  %v4966_v30 = vld [vmem:[%s6165_s3 + $0x1a4] ss:$8 sps:$4 sm:$0xff]  }
 0x1bd   :  { %v2400_v46 = vmax.f32 %v4352_v40, 0.0  ;;  %v4356_v51 = vadd.f32 %v2077_v42, %v1859_v37  ;;  %v2079_v47 = vpop.f32.mrb[11].mxu0  ;;  %2871 = vmatmul.mubr.bf16.gmra.mrb[20].mxu0 %v2420_v25  ;;  %v4961_v25 = vld [vmem:[%s6165_s3 + $0x190] ss:$8 sps:$4 sm:$0xff]   ;;  %v4964_v33 = vld [vmem:[%s6165_s3 + $0x1a0] ss:$8 sps:$4 sm:$0xff]  }
 0x1be   :  { %v2401_v48 = vmax.f32 %v4354_v44, 0.0  ;;  %v4358_v61 = vadd.f32 %v2079_v47, %v1861_v27  ;;  %2906 = vmatpush1.bf16.msra.mxu0 %v4940_v36  ;;  %v4969_v35 = vld [vmem:[%s6165_s3 + $0x1b4] ss:$8 sps:$4 sm:$0xff]   ;;  %v4967_v36 = vld [vmem:[%s6165_s3 + $0x1b0] ss:$8 sps:$4 sm:$0xff]   ;;  %v5701_v47 = vsub.s32 3, %v5535_v39 }
 0x1bf   :  { %v2404_v62 = vmax.f32 %v4356_v51, 0.0  ;;  %2907 = vmatprep.subr.bf16.mxu0 %v4945_v12  ;;  %v4972_v37 = vld [vmem:[%s6165_s3 + $0x1c4] ss:$8 sps:$4 sm:$0xff]   ;;  %v4970_v40 = vld [vmem:[%s6165_s3 + $0x1c0] ss:$8 sps:$4 sm:$0xff]   ;;  %v5698_v51 = vsub.s32 2, %v5535_v39 }
 0x1c0   :  { %v5612_v45 = vpack.c.bf16 %v2401_v48, %v2400_v46  ;;  %v2405_v49 = vmax.f32 %v4358_v61, 0.0  ;;  %v4975_v41 = vld [vmem:[%s6165_s3 + $0x1d4] ss:$8 sps:$4 sm:$0xff]   ;;  %v4973_v12 = vld [vmem:[%s6165_s3 + $0x1d0] ss:$8 sps:$4 sm:$0xff]   ;;  %v5707_v61 = vrot.slane %v5543_v38, %v5701_v47 }
 0x1c1   :  { %v2424_v50 = vpack.c.bf16 %v2404_v62, %v2400_v46  ;;  %v4978_v27 = vld [vmem:[%s6165_s3 + $0x1e4] ss:$8 sps:$4 sm:$0xff]   ;;  %v4976_v44 = vld [vmem:[%s6165_s3 + $0x1e0] ss:$8 sps:$4 sm:$0xff]   ;;  %v4981_v42 = vld [vmem:[%s6165_s3 + $0x1f4] ss:$8 sps:$4 sm:$0xff]  }
 0x1c2   :  { %v2425_v13 = vpack.c.bf16 %v2405_v49, %v2401_v48  ;;  %v5618_v63 = vpack.c.bf16 %v2405_v49, %v2404_v62  ;;  %v2083_v57 = vpop.f32.mrb[12].mxu0  ;;  %2908 = vmatpush1.bf16.msra.mxu0 %v4943_v15  ;;  %v4979_v46 = vld [vmem:[%s6165_s3 + $0x1f0] ss:$8 sps:$4 sm:$0xff]   ;;  %v351_v48 = vrot.slane %v5543_v38, %v5698_v51 }
 0x1c3   :  { %v4360_v18 = vadd.f32 %v2083_v57, %v1865_v59  ;;  %v2085_v58 = vpop.f32.mrb[13].mxu0  ;;  %2909 = vmatprep.subr.bf16.mxu0 %v4948_v17 }
 0x1c4   :  { %v4362_v22 = vadd.f32 %v2085_v58, %v1867_v4  ;;  %v2087_v60 = vpop.f32.mrb[14].mxu0  ;;  %2880 = vmatprep.mubr.bf16.mxu0 %v2425_v13 }
 0x1c5   :  { %v2408_v0 = vmax.f32 %v4360_v18, 0.0  ;;  %v4364_v1 = vadd.f32 %v2087_v60, %v1869_v6  ;;  %v2089_v2 = vpop.f32.mrb[15].mxu0  ;;  %2881 = vmatmul.mubr.bf16.gmra.mrb[24].mxu0 %v2424_v50 }
 0x1c6   :  { %v2409_v3 = vmax.f32 %v4362_v22, 0.0  ;;  %v4366_v5 = vadd.f32 %v2089_v2, %v1871_v20  ;;  %2910 = vmatpush1.bf16.msra.mxu0 %v4946_v53 }
 0x1c7   :  { %v2412_v34 = vmax.f32 %v4364_v1, 0.0  ;;  %2911 = vmatprep.subr.bf16.mxu0 %v4951_v55 }
 0x1c8   :  { %v5636_v11 = vpack.c.bf16 %v2409_v3, %v2408_v0  ;;  %v2413_v32 = vmax.f32 %v4366_v5, 0.0 }
 0x1c9   :  { %v2428_v7 = vpack.c.bf16 %v2412_v34, %v2408_v0 }
 0x1ca   :  { %v2429_v56 = vpack.c.bf16 %v2413_v32, %v2409_v3  ;;  %v5638_v9 = vpack.c.bf16 %v2413_v32, %v2412_v34  ;;  %2912 = vmatpush1.bf16.msra.mxu0 %v4949_v23 }
 0x1cb   :  { %2913 = vmatprep.subr.bf16.mxu0 %v4954_v26 }
 0x1cc   :  { %2890 = vmatprep.mubr.bf16.mxu0 %v2429_v56 }
 0x1cd   :  { %2891 = vmatmul.mubr.bf16.gmra.mrb[28].mxu0 %v2428_v7 }
 0x1ce   :  { %2914 = vmatpush1.bf16.msra.mxu0 %v4952_v14 }
 0x1cf   :  { %2915 = vmatprep.subr.bf16.mxu0 %v4957_v10 }
 0x1d2   :  { %2916 = vmatpush1.bf16.msra.mxu0 %v4955_v16 }
 0x1d3   :  { %2917 = vmatprep.subr.bf16.mxu0 %v4960_v8 }
 0x1d6   :  { %2918 = vmatpush1.bf16.msra.mxu0 %v4958_v19 }
 0x1d7   :  { %2919 = vmatprep.subr.bf16.mxu0 %v4963_v21 }
 0x1da   :  { %2920 = vmatpush1.bf16.msra.mxu0 %v4961_v25 }
 0x1db   :  { %2921 = vmatprep.subr.bf16.mxu0 %v4966_v30 }
 0x1de   :  { %2922 = vmatpush1.bf16.msra.mxu0 %v4964_v33 }
 0x1df   :  { %2923 = vmatprep.subr.bf16.mxu0 %v4969_v35 }
 0x1e2   :  { %2924 = vmatpush1.bf16.msra.mxu0 %v4967_v36 }
 0x1e3   :  { %2925 = vmatprep.subr.bf16.mxu0 %v4972_v37 }
 0x1e6   :  { %2926 = vmatpush1.bf16.msra.mxu0 %v4970_v40 }
 0x1e7   :  { %2927 = vmatprep.subr.bf16.mxu0 %v4975_v41 }
 0x1ea   :  { %2928 = vmatpush1.bf16.msra.mxu0 %v4973_v12 }
 0x1eb   :  { %2929 = vmatprep.subr.bf16.mxu0 %v4978_v27 }
 0x1ee   :  { %2930 = vmatpush1.bf16.msra.mxu0 %v4976_v44 }
 0x1ef   :  { %2931 = vmatprep.subr.bf16.mxu0 %v4981_v42 }
 0x1f2   :  { %2932 = vmatpush1.bf16.msra.mxu0 %v4979_v46 }
 0x229   :  { %v2345_v15 = vpop.f32.mrb[16].mxu1 }
 0x22a   :  { %v4367_v62 = vadd.f32 %v2345_v15, %v351_v48  ;;  %v2347_v17 = vpop.f32.mrb[17].mxu1 }
 0x22b   :  { %v4368_v49 = vadd.f32 %v2347_v17, %v5707_v61  ;;  %v2349_v59 = vpop.f32.mrb[18].mxu1 }
 0x22c   :  { %v2386_v50 = vmax.f32 %v4367_v62, 0.0  ;;  %v4369_v4 = vadd.f32 %v2349_v59, %v351_v48  ;;  %v2351_v13 = vpop.f32.mrb[19].mxu1 }
 0x22d   :  { %v2387_v57 = vmax.f32 %v4368_v49, 0.0  ;;  %v4370_v53 = vadd.f32 %v2351_v13, %v5707_v61 }
 0x22e   :  { %v2390_v6 = vmax.f32 %v4369_v4, 0.0 }
 0x22f   :  { %v5711_v18 = vpack.c.bf16 %v2387_v57, %v2386_v50  ;;  %v2391_v58 = vmax.f32 %v4370_v53, 0.0 }
 0x230   :  { %v2418_v55 = vpack.c.bf16 %v2390_v6, %v2386_v50 }
 0x231   :  { %v2419_v20 = vpack.c.bf16 %v2391_v58, %v2387_v57  ;;  %v5713_v38 = vpack.c.bf16 %v2391_v58, %v2390_v6  ;;  %v2355_v22 = vpop.f32.mrb[20].mxu1 }
 0x232   :  { %v4371_v60 = vadd.f32 %v2355_v22, %v351_v48  ;;  %v2357_v0 = vpop.f32.mrb[21].mxu1 }
 0x233   :  { %v4372_v1 = vadd.f32 %v2357_v0, %v5707_v61  ;;  %v2359_v2 = vpop.f32.mrb[22].mxu1  ;;  %2933 = vmatprep.mubr.bf16.mxu0 %v2419_v20  ;;  %v5093_v0 = vmov 0  }
 0x234   :  { %v2394_v3 = vmax.f32 %v4371_v60, 0.0  ;;  %v4373_v5 = vadd.f32 %v2359_v2, %v351_v48  ;;  %v2361_v23 = vpop.f32.mrb[23].mxu1  ;;  %2934 = vmatmul.mubr.bf16.vlgmr.msra.gmra.mrb[16].mxu0 %v2418_v55  ;;  %4500 = vset.pattern.permute.xlu0 %v5093_v0 }
 0x235   :  { %v2395_v34 = vmax.f32 %v4372_v1, 0.0  ;;  %v4374_v26 = vadd.f32 %v2361_v23, %v5707_v61  ;;  %4501 = vset.pattern.permute.xlu1 %v5093_v0 }
 0x236   :  { %v2398_v32 = vmax.f32 %v4373_v5, 0.0 }
 0x237   :  { %v5717_v7 = vpack.c.bf16 %v2395_v34, %v2394_v3  ;;  %v2399_v56 = vmax.f32 %v4374_v26, 0.0 }
 0x238   :  { %v2422_v14 = vpack.c.bf16 %v2398_v32, %v2394_v3 }
 0x239   :  { %v2423_v10 = vpack.c.bf16 %v2399_v56, %v2395_v34  ;;  %v5719_v16 = vpack.c.bf16 %v2399_v56, %v2398_v32  ;;  %v2365_v8 = vpop.f32.mrb[24].mxu1 }
 0x23a   :  { %v4375_v19 = vadd.f32 %v2365_v8, %v351_v48  ;;  %v2367_v21 = vpop.f32.mrb[25].mxu1 }
 0x23b   :  { %v4376_v25 = vadd.f32 %v2367_v21, %v5707_v61  ;;  %v2369_v30 = vpop.f32.mrb[26].mxu1  ;;  %2943 = vmatprep.mubr.bf16.mxu0 %v2423_v10 }
 0x23c   :  { %v2402_v33 = vmax.f32 %v4375_v19, 0.0  ;;  %v4377_v35 = vadd.f32 %v2369_v30, %v351_v48  ;;  %v2371_v36 = vpop.f32.mrb[27].mxu1  ;;  %2944 = vmatmul.mubr.bf16.gmra.mrb[20].mxu0 %v2422_v14 }
 0x23d   :  { %v2403_v37 = vmax.f32 %v4376_v25, 0.0  ;;  %v4378_v40 = vadd.f32 %v2371_v36, %v5707_v61 }
 0x23e   :  { %v2406_v41 = vmax.f32 %v4377_v35, 0.0 }
 0x23f   :  { %v5723_v12 = vpack.c.bf16 %v2403_v37, %v2402_v33  ;;  %v2407_v27 = vmax.f32 %v4378_v40, 0.0 }
 0x240   :  { %v2426_v44 = vpack.c.bf16 %v2406_v41, %v2402_v33 }
 0x241   :  { %v2427_v42 = vpack.c.bf16 %v2407_v27, %v2403_v37  ;;  %v5725_v46 = vpack.c.bf16 %v2407_v27, %v2406_v41  ;;  %v2375_v15 = vpop.f32.mrb[28].mxu1 }
 0x242   :  { %v4379_v62 = vadd.f32 %v2375_v15, %v351_v48  ;;  %v2377_v17 = vpop.f32.mrb[29].mxu1 }
 0x243   :  { %v4380_v49 = vadd.f32 %v2377_v17, %v5707_v61  ;;  %v2379_v59 = vpop.f32.mrb[30].mxu1  ;;  %2953 = vmatprep.mubr.bf16.mxu0 %v2427_v42 }
 0x244   :  { %v2410_v50 = vmax.f32 %v4379_v62, 0.0  ;;  %v4381_v4 = vadd.f32 %v2379_v59, %v351_v48  ;;  %v2381_v13 = vpop.f32.mrb[31].mxu1  ;;  %2954 = vmatmul.mubr.bf16.gmra.mrb[24].mxu0 %v2426_v44  ;;  %v2496_v48 = vld [vmem:[%s6166_s4] sm:$0x3] }
 0x245   :  { %v2411_v57 = vmax.f32 %v4380_v49, 0.0  ;;  %v4382_v53 = vadd.f32 %v2381_v13, %v5707_v61  ;;  %v2505_v1 = vrot.slane %v2496_v48, %v5546_v24  ;;  %v5738_v10 = vrot.slane %v2496_v48, %v5538_v31 }
 0x246   :  { %v2414_v6 = vmax.f32 %v4381_v4, 0.0 }
 0x247   :  { %v5729_v58 = vpack.c.bf16 %v2411_v57, %v2410_v50  ;;  %v2415_v55 = vmax.f32 %v4382_v53, 0.0 }
 0x248   :  { %v2430_v20 = vpack.c.bf16 %v2414_v6, %v2410_v50 }
 0x249   :  { %v2431_v22 = vpack.c.bf16 %v2415_v55, %v2411_v57  ;;  %v5731_v60 = vpack.c.bf16 %v2415_v55, %v2414_v6 }
 0x24b   :  { %2963 = vmatprep.mubr.bf16.mxu0 %v2431_v22 }
 0x24c   :  { %2964 = vmatmul.mubr.bf16.gmra.mrb[28].mxu0 %v2430_v20 }
 0x307   :  { %v2935_v61 = vpop.f32.mrb[16].mxu0 }
 0x308   :  { %v2937_v2 = vpop.f32.mrb[17].mxu0  ;;  %v4383_v33 = vadd.f32 %v2935_v61, %v5738_v10 }
 0x309   :  { %v4384_v3 = vadd.f32 %v2937_v2, %v2505_v1  ;;  %v2939_v5 = vpop.f32.mrb[18].mxu0 }
 0x30a   :  { %v2941_v23 = vpop.f32.mrb[19].mxu0  ;;  %v4385_v37 = vadd.f32 %v2939_v5, %v5738_v10 }
 0x30b   :  { %v4291_v34 = vmul.f32 -1.442695, %v4384_v3  ;;  %v4386_v26 = vadd.f32 %v2941_v23, %v2505_v1 }
 0x30d   :  { %4982 = vpow2.f32 %v4291_v34  ;;  %v4292_v32 = vmul.f32 -1.442695, %v4386_v26  ;;  %v4299_v34 = vld [vmem:[%s6167_s5] ss:$0 sm:$0xff] }
 0x30f   :  { %4984 = vpow2.f32 %v4292_v32  ;;  %v2945_v56 = vpop.f32.mrb[20].mxu0 }
 0x310   :  { %v2947_v14 = vpop.f32.mrb[21].mxu0  ;;  %v4387_v50 = vadd.f32 %v2945_v56, %v5738_v10 }
 0x311   :  { %v4388_v8 = vadd.f32 %v2947_v14, %v2505_v1  ;;  %v2949_v19 = vpop.f32.mrb[22].mxu0 }
 0x312   :  { %v2951_v21 = vpop.f32.mrb[23].mxu0  ;;  %v4389_v57 = vadd.f32 %v2949_v19, %v5738_v10 }
 0x313   :  { %v4293_v25 = vmul.f32 -1.442695, %v4388_v8  ;;  %v4390_v30 = vadd.f32 %v2951_v21, %v2505_v1 }
 0x315   :  { %4986 = vpow2.f32 %v4293_v25  ;;  %v4294_v35 = vmul.f32 -1.442695, %v4390_v30 }
 0x317   :  { %v4983_v36 = vpop.eup %4982  ;;  %4988 = vpow2.f32 %v4294_v35  ;;  %v2955_v40 = vpop.f32.mrb[24].mxu0 }
 0x318   :  { %v3006_v41 = vadd.f32 1.0, %v4983_v36  ;;  %v2957_v27 = vpop.f32.mrb[25].mxu0  ;;  %4990 = vtanh.f32 %v4383_v33  ;;  %v4391_v32 = vadd.f32 %v2955_v40, %v5738_v10 }
 0x319   :  { %v4985_v44 = vpop.eup %4984  ;;  %v4392_v42 = vadd.f32 %v2957_v27, %v2505_v1  ;;  %v2959_v15 = vpop.f32.mrb[26].mxu0 }
 0x31a   :  { %4992 = vrcp.f32 %v3006_v41  ;;  %v3007_v62 = vadd.f32 1.0, %v4985_v44  ;;  %v2961_v17 = vpop.f32.mrb[27].mxu0  ;;  %v4393_v21 = vadd.f32 %v2959_v15, %v5738_v10 }
 0x31b   :  { %4994 = vtanh.f32 %v4385_v37  ;;  %v4295_v49 = vmul.f32 -1.442695, %v4392_v42  ;;  %v4394_v59 = vadd.f32 %v2961_v17, %v2505_v1 }
 0x31c   :  { %4996 = vrcp.f32 %v3007_v62 }
 0x31d   :  { %4998 = vpow2.f32 %v4295_v49  ;;  %v4296_v4 = vmul.f32 -1.442695, %v4394_v59 }
 0x31f   :  { %v4987_v13 = vpop.eup %4986  ;;  %5000 = vpow2.f32 %v4296_v4  ;;  %v2965_v53 = vpop.f32.mrb[28].mxu0 }
 0x320   :  { %v3008_v6 = vadd.f32 1.0, %v4987_v13  ;;  %v2967_v55 = vpop.f32.mrb[29].mxu0  ;;  %5002 = vtanh.f32 %v4387_v50  ;;  %v4395_v27 = vadd.f32 %v2965_v53, %v5738_v10 }
 0x321   :  { %v4989_v20 = vpop.eup %4988  ;;  %v4396_v22 = vadd.f32 %v2967_v55, %v2505_v1  ;;  %v2969_v0 = vpop.f32.mrb[30].mxu0 }
 0x322   :  { %5004 = vrcp.f32 %v3008_v6  ;;  %v3009_v48 = vadd.f32 1.0, %v4989_v20  ;;  %v2971_v61 = vpop.f32.mrb[31].mxu0  ;;  %v4991_v2 = vpop.eup %4990  ;;  %v4397_v62 = vadd.f32 %v2969_v0, %v5738_v10 }
 0x323   :  { %5006 = vtanh.f32 %v4389_v57  ;;  %v4297_v3 = vmul.f32 -1.442695, %v4396_v22  ;;  %v4398_v5 = vadd.f32 %v2971_v61, %v2505_v1 }
 0x324   :  { %v4993_v23 = vpop.eup %4992  ;;  %5008 = vrcp.f32 %v3009_v48 }
 0x325   :  { %v4995_v26 = vpop.eup %4994  ;;  %5010 = vpow2.f32 %v4297_v3  ;;  %v4298_v56 = vmul.f32 -1.442695, %v4398_v5  ;;  %v3030_v14 = vmul.f32 %v4993_v23, %v4991_v2 }
 0x326   :  { %v4997_v8 = vpop.eup %4996 }
 0x327   :  { %v4999_v19 = vpop.eup %4998  ;;  %5012 = vpow2.f32 %v4298_v56  ;;  %v3045_v25 = vmul.f32 %v4299_v34, %v3030_v14  ;;  %v3031_v30 = vmul.f32 %v4997_v8, %v4995_v26  ;;  %v4300_v56 = vld [vmem:[#allocation2] ss:$0 sm:$0xff] }
 0x328   :  { %v3010_v1 = vadd.f32 1.0, %v4999_v19  ;;  %5014 = vtanh.f32 %v4391_v32 }
 0x329   :  { %v5001_v33 = vpop.eup %5000  ;;  %3053 = vadd.xlane.f32.xlu0 %v3045_v25  ;;  %v3046_v37 = vmul.f32 %v4299_v34, %v3031_v30  ;;  %v3096_v25 = vand.u32 127, %v340_v29 }
 0x32a   :  { %5016 = vrcp.f32 %v3010_v1  ;;  %v3011_v35 = vadd.f32 1.0, %v5001_v33  ;;  %v5003_v36 = vpop.eup %5002 }
 0x32b   :  { %5018 = vtanh.f32 %v4393_v21  ;;  %v5753_v33 = vsub.s32 %v3096_v25, %v5535_v39 }
 0x32c   :  { %v5005_v40 = vpop.eup %5004  ;;  %5020 = vrcp.f32 %v3011_v35 }
 0x32d   :  { %v5007_v41 = vpop.eup %5006  ;;  %3055 = vadd.xlane.f32.xlu0 %v3046_v37  ;;  %v3032_v44 = vmul.f32 %v5005_v40, %v5003_v36  ;;  %5022 = vtanh.f32 %v4395_v27 }
 0x32e   :  { %v5009_v42 = vpop.eup %5008 }
 0x32f   :  { %v5011_v15 = vpop.eup %5010  ;;  %v3047_v17 = vmul.f32 %v4299_v34, %v3032_v44  ;;  %v3033_v49 = vmul.f32 %v5009_v42, %v5007_v41 }
 0x330   :  { %v3012_v59 = vadd.f32 1.0, %v5011_v15 }
 0x331   :  { %v5013_v50 = vpop.eup %5012  ;;  %3057 = vadd.xlane.f32.xlu1 %v3047_v17  ;;  %v3048_v57 = vmul.f32 %v4299_v34, %v3033_v49 }
 0x332   :  { %5024 = vrcp.f32 %v3012_v59  ;;  %v3013_v4 = vadd.f32 1.0, %v5013_v50  ;;  %v5015_v13 = vpop.eup %5014 }
 0x333   :  { %5026 = vtanh.f32 %v4397_v62 }
 0x334   :  { %v5017_v6 = vpop.eup %5016  ;;  %5028 = vrcp.f32 %v3013_v4 }
 0x335   :  { %v5019_v53 = vpop.eup %5018  ;;  %3059 = vadd.xlane.f32.xlu1 %v3048_v57  ;;  %v3034_v55 = vmul.f32 %v5017_v6, %v5015_v13 }
 0x336   :  { %v5021_v20 = vpop.eup %5020 }
 0x337   :  { %v3049_v22 = vmul.f32 %v4299_v34, %v3034_v55  ;;  %v3035_v48 = vmul.f32 %v5021_v20, %v5019_v53  ;;  %v5023_v0 = vpop.eup %5022 }
 0x339   :  { %3061 = vadd.xlane.f32.xlu0 %v3049_v22  ;;  %v3050_v10 = vmul.f32 %v4299_v34, %v3035_v48 }
 0x33b   :  { %3063 = vadd.xlane.f32.xlu1 %v3050_v10 }
 0x33c   :  { %v5025_v61 = vpop.eup %5024 }
 0x33d   :  { %v5027_v2 = vpop.eup %5026  ;;  %v3036_v3 = vmul.f32 %v5025_v61, %v5023_v0  ;;  %v3179_v61 = vsub.s32 7, %v5535_v39 }
 0x33e   :  { %v5029_v5 = vpop.eup %5028 }
 0x33f   :  { %v3051_v23 = vmul.f32 %v4299_v34, %v3036_v3  ;;  %v3037_v26 = vmul.f32 %v5029_v5, %v5027_v2 }
 0x341   :  { %3065 = vadd.xlane.f32.xlu0 %v3051_v23  ;;  %v3052_v32 = vmul.f32 %v4299_v34, %v3037_v26 }
 0x343   :  { %3067 = vadd.xlane.f32.xlu1 %v3052_v32 }
 0x357   :  { %3076 = vperm.xlu0 %4500, %v4300_v56  }
 0x3b6   :  { %v3054_v14 = vpop.xlane.xlu0 %3053 }
 0x3ba   :  { %v3056_v8 = vpop.xlane.xlu0 %3055 }
 0x3be   :  { %v3058_v19 = vpop.xlane.xlu1 %3057 }
 0x3c2   :  { %v3060_v30 = vpop.xlane.xlu1 %3059 }
 0x3c6   :  { %v3062_v21 = vpop.xlane.xlu0 %3061 }
 0x3c8   :  { %v3064_v35 = vpop.xlane.xlu1 %3063 }
 0x3ce   :  { %v3066_v1 = vpop.xlane.xlu0 %3065 }
 0x3d0   :  { %v3068_v62 = vpop.xlane.xlu1 %3067 }
 0x3d6   :  { %v3077_v36 = vpop.permute.xlu0 %3076 }
 0x3d7   :  { %v3079_v37 = vadd.f32 %v3077_v36, %v3054_v14  ;;  %v3080_v40 = vadd.f32 %v3077_v36, %v3056_v8  ;;  %v3081_v41 = vadd.f32 %v3077_v36, %v3058_v19  ;;  %v3082_v34 = vadd.f32 %v3077_v36, %v3060_v30 }
 0x3d8   :  { %v3083_v27 = vadd.f32 %v3077_v36, %v3062_v21  ;;  %v5755_v44 = vadd.f32 %v3077_v36, %v3064_v35  ;;  %v5760_v17 = vadd.f32 %v3077_v36, %v3066_v1  ;;  %v3086_v49 = vadd.f32 %v3077_v36, %v3068_v62 }
 0x3d9   :  { %v3100_v42 = vrot.slane %v3079_v37, %v5753_v33  ;;  %v3104_v29 = vrot.slane %v3080_v40, %v5753_v33  ;;  %v3108_v15 = vrot.slane %v3081_v41, %v5753_v33  ;;  %v3112_v59 = vrot.slane %v3082_v34, %v5753_v33 }
 0x3da   :  { %v3116_v4 = vrot.slane %v3083_v27, %v5753_v33  ;;  %v3120_v57 = vrot.slane %v5755_v44, %v5753_v33  ;;  %v3124_v53 = vrot.slane %v5760_v17, %v5753_v33  ;;  %v3128_v20 = vrot.slane %v3086_v49, %v5753_v33 }
 0x3db   :  { %v3130_v50 = vsel %vm3129_vm0, %v3104_v29, %v3100_v42  ;;  %v3167_v8 = vsub.s32 4, %v5535_v39  ;;  %v3171_v1 = vsub.s32 5, %v5535_v39 }
 0x3dc   :  { %v3132_v13 = vsel %vm3131_vm1, %v3108_v15, %v3130_v50 }
 0x3dd   :  { %v3134_v6 = vsel %vm3133_vm2, %v3112_v59, %v3132_v13 }
 0x3de   :  { %v3136_v55 = vsel %vm3135_vm3, %v3116_v4, %v3134_v6 }
 0x3df   :  { %v3138_v22 = vsel %vm3137_vm4, %v3120_v57, %v3136_v55 }
 0x3e0   :  { %v3140_v48 = vsel %vm3139_vm5, %v3124_v53, %v3138_v22 }
 0x3e1   :  { %v3142_v10 = vsel %vm3141_vm6, %v3128_v20, %v3140_v48 }
 0x3e2   :  { %v3145_v0 = vsel %vm3144_vm7, %v3142_v10, -inf }
 0x3e3   :  { %3146 = vmax.xlane.f32.xlu1 %v3145_v0 }
 0x470   :  { %v3147_v2 = vpop.xlane.xlu1 %3146 }
 0x471   :  { %v3152_v3 = vrot.slane %v3147_v2, %v5538_v31  ;;  %v3156_v5 = vrot.slane %v3147_v2, %v5546_v24  ;;  %v3180_v23 = vrot.slane %v3147_v2, %v3179_v61  ;;  %v3160_v26 = vrot.slane %v3147_v2, %v5698_v51 }
 0x472   :  { %v3164_v21 = vrot.slane %v3147_v2, %v5701_v47  ;;  %v3168_v36 = vrot.slane %v3147_v2, %v3167_v8 }
 0x473   :  { %v3189_v32 = vsub.f32 %v3079_v37, %v3152_v3  ;;  %v3190_v56 = vsub.f32 %v3080_v40, %v3156_v5  ;;  %v3196_v19 = vsub.f32 %v3086_v49, %v3180_v23  ;;  %v3191_v25 = vsub.f32 %v3081_v41, %v3160_v26 }
 0x474   :  { %v3192_v42 = vsub.f32 %v3082_v34, %v3164_v21  ;;  %v3175_v37 = vsub.s32 6, %v5535_v39  ;;  %v3172_v40 = vrot.slane %v3147_v2, %v3171_v1  ;;  %v3193_v15 = vsub.f32 %v3083_v27, %v3168_v36 }
 0x475   :  { %v3197_v14 = vmul.f32 1.442695, %v3189_v32  ;;  %v3199_v30 = vmul.f32 1.442695, %v3190_v56  ;;  %v3211_v35 = vmul.f32 1.442695, %v3196_v19  ;;  %v3425_v39 = vunpack.c.l.bf16 %v5564_v52 }
 0x476   :  { %v3201_v29 = vmul.f32 1.442695, %v3191_v25  ;;  %v3203_v41 = vmul.f32 1.442695, %v3192_v42  ;;  %v3176_v49 = vrot.slane %v3147_v2, %v3175_v37  ;;  %v3194_v34 = vsub.f32 %v5755_v44, %v3172_v40 }
 0x477   :  { %5030 = vpow2.f32 %v3197_v14  ;;  %v3205_v59 = vmul.f32 1.442695, %v3193_v15 }
 0x478   :  { %5032 = vpow2.f32 %v3199_v30  ;;  %v3195_v4 = vsub.f32 %v5760_v17, %v3176_v49  ;;  %v3207_v13 = vmul.f32 1.442695, %v3194_v34 }
 0x479   :  { %5034 = vpow2.f32 %v3211_v35 }
 0x47a   :  { %5036 = vpow2.f32 %v3201_v29  ;;  %v3209_v6 = vmul.f32 1.442695, %v3195_v4 }
 0x47b   :  { %5038 = vpow2.f32 %v3203_v41 }
 0x47c   :  { %5040 = vpow2.f32 %v3205_v59 }
 0x47d   :  { %5042 = vpow2.f32 %v3207_v13 }
 0x47e   :  { %5044 = vpow2.f32 %v3209_v6 }
 0x481   :  { %v5791_v62 = vpop.eup %5030 }
 0x482   :  { %3222 = vperm.xlu1 %4501, %v5791_v62   ;;  %v5033_v50 = vpop.eup %5032 }
 0x483   :  { %v5798_v27 = vpop.eup %5034 }
 0x484   :  { %v5037_v57 = vpop.eup %5036  ;;  %3243 = vperm.xlu0 %4500, %v5798_v27  }
 0x485   :  { %v5039_v53 = vpop.eup %5038 }
 0x486   :  { %3225 = vperm.xlu1 %4501, %v5033_v50   ;;  %v5041_v44 = vpop.eup %5040 }
 0x487   :  { %v5043_v55 = vpop.eup %5042 }
 0x488   :  { %v5801_v20 = vpop.eup %5044 }
 0x48a   :  { %3228 = vperm.xlu1 %4501, %v5037_v57  }
 0x48e   :  { %3231 = vperm.xlu1 %4501, %v5039_v53  }
 0x492   :  { %3234 = vperm.xlu1 %4501, %v5041_v44  }
 0x496   :  { %3237 = vperm.xlu1 %4501, %v5043_v55  }
 0x49a   :  { %3240 = vperm.xlu1 %4501, %v5801_v20  }
 0x501   :  { %v3223_v17 = vpop.permute.xlu1 %3222 }
 0x502   :  { %v3248_v5 = vrot.slane %v3223_v17, %v5753_v33 }
 0x503   :  { %v3244_v19 = vpop.permute.xlu0 %3243 }
 0x504   :  { %v3276_v42 = vrot.slane %v3244_v19, %v5753_v33  ;;  %v3433_v19 = vunpack.c.l.bf16 %v5588_v28 }
 0x505   :  { %v3226_v22 = vpop.permute.xlu1 %3225 }
 0x506   :  { %v3252_v2 = vrot.slane %v3226_v22, %v5753_v33 }
 0x508   :  { %v3277_v56 = vsel %vm3129_vm0, %v3252_v2, %v3248_v5 }
 0x509   :  { %v3229_v48 = vpop.permute.xlu1 %3228 }
 0x50a   :  { %v3256_v3 = vrot.slane %v3229_v48, %v5753_v33 }
 0x50c   :  { %v3278_v21 = vsel %vm3131_vm1, %v3256_v3, %v3277_v56 }
 0x50d   :  { %v3232_v10 = vpop.permute.xlu1 %3231 }
 0x50e   :  { %v3260_v23 = vrot.slane %v3232_v10, %v5753_v33 }
 0x510   :  { %v3279_v25 = vsel %vm3133_vm2, %v3260_v23, %v3278_v21  ;;  %v3437_v21 = vunpack.c.l.bf16 %v5594_v43 }
 0x511   :  { %v3235_v0 = vpop.permute.xlu1 %3234 }
 0x512   :  { %v3264_v32 = vrot.slane %v3235_v0, %v5753_v33 }
 0x514   :  { %v3280_v35 = vsel %vm3135_vm3, %v3264_v32, %v3279_v25  ;;  %v3441_v25 = vunpack.c.l.bf16 %v5612_v45 }
 0x515   :  { %v3238_v26 = vpop.permute.xlu1 %3237 }
 0x516   :  { %v3268_v14 = vrot.slane %v3238_v26, %v5753_v33 }
 0x518   :  { %v3281_v29 = vsel %vm3137_vm4, %v3268_v14, %v3280_v35 }
 0x519   :  { %v3241_v30 = vpop.permute.xlu1 %3240 }
 0x51a   :  { %v3272_v36 = vrot.slane %v3241_v30, %v5753_v33 }
 0x51c   :  { %v3282_v40 = vsel %vm3139_vm5, %v3272_v36, %v3281_v29  ;;  %v3427_v29 = vunpack.c.l.bf16 %v5711_v18 }
 0x51d   :  { %v3283_v15 = vsel %vm3141_vm6, %v3276_v42, %v3282_v40  ;;  %v3428_v40 = vunpack.c.h.bf16 %v5711_v18 }
 0x51e   :  { %v3285_v41 = vsel %vm3144_vm7, %v3283_v15, 0.0  ;;  %v3431_v15 = vunpack.c.l.bf16 %v5713_v38 }
 0x51f   :  { %3286 = vadd.xlane.f32.xlu1 %v3285_v41  ;;  %v3432_v41 = vunpack.c.h.bf16 %v5713_v38  ;;  %v3721_v38 = vld [vmem:[%s6169_s7] sm:$0xf]  ;;  %s5094_s7 = smov 8  }
 0x5ac   :  { %v3287_v49 = vpop.xlane.xlu1 %3286 }
 0x5ad   :  { %v3296_v34 = vrot.slane %v3287_v49, %v5546_v24  ;;  %v3300_v59 = vrot.slane %v3287_v49, %v5698_v51  ;;  %v3292_v4 = vrot.slane %v3287_v49, %v5538_v31  ;;  %v3304_v13 = vrot.slane %v3287_v49, %v5701_v47 }
 0x5ae   :  { %v3308_v17 = vrot.slane %v3287_v49, %v3167_v8  ;;  %v3312_v10 = vrot.slane %v3287_v49, %v3171_v1  ;;  %v3316_v3 = vrot.slane %v3287_v49, %v3175_v37  ;;  %v3320_v8 = vrot.slane %v3287_v49, %v3179_v61 }
 0x5af   :  { %5046 = vrcp.f32 %v3296_v34  ;;  %v3426_v61 = vunpack.c.h.bf16 %v5564_v52  ;;  %v3435_v49 = vunpack.c.l.bf16 %v5717_v7  ;;  %v3436_v34 = vunpack.c.h.bf16 %v5717_v7 }
 0x5b0   :  { %5048 = vrcp.f32 %v3300_v59  ;;  %v3439_v59 = vunpack.c.l.bf16 %v5719_v16 }
 0x5b1   :  { %5050 = vrcp.f32 %v3292_v4  ;;  %v3440_v4 = vunpack.c.h.bf16 %v5719_v16 }
 0x5b2   :  { %5052 = vrcp.f32 %v3304_v13 }
 0x5b3   :  { %5054 = vrcp.f32 %v3308_v17 }
 0x5b4   :  { %5056 = vrcp.f32 %v3312_v10 }
 0x5b5   :  { %5058 = vrcp.f32 %v3316_v3 }
 0x5b6   :  { %5060 = vrcp.f32 %v3320_v8 }
 0x5b9   :  { %v5047_v6 = vpop.eup %5046 }
 0x5ba   :  { %v3332_v22 = vmul.f32 %v5047_v6, %v5033_v50  ;;  %v5049_v48 = vpop.eup %5048 }
 0x5bb   :  { %v3334_v0 = vmul.f32 %v5049_v48, %v5037_v57  ;;  %v5051_v2 = vpop.eup %5050 }
 0x5bc   :  { %3464 = vperm.xlu0 %4500, %v3332_v22   ;;  %v3330_v5 = vmul.f32 %v5051_v2, %v5791_v62  ;;  %v5053_v23 = vpop.eup %5052 }
 0x5bd   :  { %v3336_v50 = vmul.f32 %v5053_v23, %v5039_v53  ;;  %v5055_v26 = vpop.eup %5054  ;;  %v3429_v53 = vunpack.c.l.bf16 %v5570_v54 }
 0x5be   :  { %v3338_v1 = vmul.f32 %v5055_v26, %v5041_v44  ;;  %v5057_v57 = vpop.eup %5056  ;;  %v3430_v44 = vunpack.c.h.bf16 %v5570_v54 }
 0x5bf   :  { %v3340_v32 = vmul.f32 %v5057_v57, %v5043_v55  ;;  %v5059_v56 = vpop.eup %5058  ;;  %v3434_v55 = vunpack.c.h.bf16 %v5588_v28 }
 0x5c0   :  { %3469 = vperm.xlu0 %4500, %v3334_v0   ;;  %v3342_v37 = vmul.f32 %v5059_v56, %v5801_v20  ;;  %v5061_v14 = vpop.eup %5060  ;;  %v3438_v20 = vunpack.c.h.bf16 %v5594_v43  ;;  %v5880_v56 = vrot.slane %v3721_v38, %v5546_v24 }
 0x5c1   :  { %v3344_v62 = vmul.f32 %v5061_v14, %v5798_v27  ;;  %v5886_v14 = vrot.slane %v3721_v38, %v5701_v47 }
 0x5c4   :  { %3459 = vperm.xlu0 %4500, %v3330_v5  }
 0x5c8   :  { %3474 = vperm.xlu0 %4500, %v3336_v50  }
 0x5cc   :  { %3479 = vperm.xlu0 %4500, %v3338_v1  }
 0x5d0   :  { %3484 = vperm.xlu0 %4500, %v3340_v32   ;;  %v5877_v32 = vrot.slane %v3721_v38, %v5538_v31 }
 0x5d4   :  { %3489 = vperm.xlu0 %4500, %v3342_v37   ;;  %v5883_v37 = vrot.slane %v3721_v38, %v5698_v51 }
 0x5d8   :  { %3494 = vperm.xlu0 %4500, %v3344_v62  }
 0x63b   :  { %v5863_v48 = vpop.permute.xlu0 %3464 }
 0x63c   :  { %v3501_v7 = vmul.f32 %v5863_v48, %v3429_v53  ;;  %v3502_v10 = vmul.f32 %v5863_v48, %v3430_v44  ;;  %v3503_v0 = vmul.f32 %v5863_v48, %v3431_v15  ;;  %v3504_v2 = vmul.f32 %v5863_v48, %v3432_v41 }
 0x63e   :  { %v3553_v50 = vrot.slane %v3501_v7, 4  ;;  %v3559_v26 = vrot.slane %v3502_v10, 4  ;;  %v3565_v1 = vrot.slane %v3503_v0, 4  ;;  %v3571_v57 = vrot.slane %v3504_v2, 4 }
 0x63f   :  { %v5888_v62 = vpop.permute.xlu0 %3469 }
 0x640   :  { %6178 = vst [vmem:[#allocation7_spill] sm:$0xff] %v5888_v62  ;;  %v3554_v53 = vadd.f32 %v3553_v50, %v3501_v7  ;;  %v3560_v44 = vadd.f32 %v3559_v26, %v3502_v10  ;;  %v3566_v15 = vadd.f32 %v3565_v1, %v3503_v0  ;;  %v3572_v41 = vadd.f32 %v3571_v57, %v3504_v2 }
 0x641   :  { %v3505_v8 = vmul.f32 %v5888_v62, %v3433_v19  ;;  %v3506_v31 = vmul.f32 %v5888_v62, %v3434_v55  ;;  %v3507_v23 = vmul.f32 %v5888_v62, %v3435_v49  ;;  %v3508_v24 = vmul.f32 %v5888_v62, %v3436_v34 }
 0x642   :  { %v3555_v28 = vrot.slane %v3554_v53, 2  ;;  %v3561_v51 = vrot.slane %v3560_v44, 2  ;;  %v3567_v42 = vrot.slane %v3566_v15, 2  ;;  %v3573_v5 = vrot.slane %v3572_v41, 2 }
 0x643   :  { %v3577_v47 = vrot.slane %v3505_v8, 4  ;;  %v3583_v38 = vrot.slane %v3506_v31, 4  ;;  %v3589_v3 = vrot.slane %v3507_v23, 4  ;;  %v3595_v54 = vrot.slane %v3508_v24, 4 }
 0x644   :  { %v3556_v7 = vadd.f32 %v3555_v28, %v3554_v53  ;;  %v3562_v10 = vadd.f32 %v3561_v51, %v3560_v44  ;;  %v3568_v0 = vadd.f32 %v3567_v42, %v3566_v15  ;;  %v3574_v2 = vadd.f32 %v3573_v5, %v3572_v41  ;;  %v3460_v44 = vpop.permute.xlu0 %3459 }
 0x645   :  { %v3578_v50 = vadd.f32 %v3577_v47, %v3505_v8  ;;  %v3584_v19 = vadd.f32 %v3583_v38, %v3506_v31  ;;  %v3590_v26 = vadd.f32 %v3589_v3, %v3507_v23  ;;  %v3596_v55 = vadd.f32 %v3595_v54, %v3508_v24 }
 0x646   :  { %v3557_v1 = vrot.slane %v3556_v7, 1  ;;  %v3563_v49 = vrot.slane %v3562_v10, 1  ;;  %v3569_v57 = vrot.slane %v3568_v0, 1  ;;  %v3575_v34 = vrot.slane %v3574_v2, 1 }
 0x647   :  { %v3579_v36 = vrot.slane %v3578_v50, 2  ;;  %v3585_v22 = vrot.slane %v3584_v19, 2  ;;  %v3591_v17 = vrot.slane %v3590_v26, 2  ;;  %v3597_v35 = vrot.slane %v3596_v55, 2 }
 0x648   :  { %v3558_v30 = vadd.f32 %v3557_v1, %v3556_v7  ;;  %v3564_v6 = vadd.f32 %v3563_v49, %v3562_v10  ;;  %v3570_v13 = vadd.f32 %v3569_v57, %v3568_v0  ;;  %v3576_v27 = vadd.f32 %v3575_v34, %v3574_v2 }
 0x649   :  { %v3580_v28 = vadd.f32 %v3579_v36, %v3578_v50  ;;  %v3586_v53 = vadd.f32 %v3585_v22, %v3584_v19  ;;  %v3592_v42 = vadd.f32 %v3591_v17, %v3590_v26  ;;  %v3598_v5 = vadd.f32 %v3597_v35, %v3596_v55  ;;  %v5931_v19 = vpop.permute.xlu0 %3474 }
 0x64a   :  { %v5895_v8 = vmul.f32 %v5877_v32, %v3558_v30  ;;  %v5898_v54 = vmul.f32 %v5880_v56, %v3564_v6  ;;  %v5901_v3 = vmul.f32 %v5883_v37, %v3570_v13  ;;  %v5904_v23 = vmul.f32 %v5886_v14, %v3576_v27  ;;  %6179 = vst [vmem:[#allocation8_spill] sm:$0xff] %v5931_v19 }
 0x64b   :  { %v3581_v15 = vrot.slane %v3580_v28, 1  ;;  %v3587_v41 = vrot.slane %v3586_v53, 1  ;;  %v3593_v31 = vrot.slane %v3592_v42, 1  ;;  %v3599_v36 = vrot.slane %v3598_v5, 1 }
 0x64c   :  { %v3893_v6 = vrot.slane %v5863_v48, %v5753_v33  ;;  %v3497_v47 = vmul.f32 %v3460_v44, %v3425_v39  ;;  %v3498_v38 = vmul.f32 %v3460_v44, %v3426_v61  ;;  %v3499_v7 = vmul.f32 %v3460_v44, %v3427_v29 }
 0x64d   :  { %v3582_v22 = vadd.f32 %v3581_v15, %v3580_v28  ;;  %v3588_v13 = vadd.f32 %v3587_v41, %v3586_v53  ;;  %v3594_v24 = vadd.f32 %v3593_v31, %v3592_v42  ;;  %v3600_v51 = vadd.f32 %v3599_v36, %v3598_v5 }
 0x64e   :  { %v3500_v39 = vmul.f32 %v3460_v44, %v3428_v40  ;;  %v3529_v52 = vrot.slane %v3497_v47, 4  ;;  %v3535_v61 = vrot.slane %v3498_v38, 4  ;;  %v3541_v50 = vrot.slane %v3499_v7, 4 }
 0x64f   :  { %v5919_v10 = vmul.f32 %v5877_v32, %v3582_v22  ;;  %v5922_v48 = vmul.f32 %v5880_v56, %v3588_v13  ;;  %v5925_v0 = vmul.f32 %v5883_v37, %v3594_v24  ;;  %v5934_v29 = vmul.f32 %v5886_v14, %v3600_v51 }
 0x650   :  { %v3530_v49 = vadd.f32 %v3529_v52, %v3497_v47  ;;  %v3536_v57 = vadd.f32 %v3535_v61, %v3498_v38  ;;  %v3542_v34 = vadd.f32 %v3541_v50, %v3499_v7  ;;  %v3547_v28 = vrot.slane %v3500_v39, 4 }
 0x651   :  { %v3889_v18 = vrot.slane %v3460_v44, %v5753_v33  ;;  %v3509_v40 = vmul.f32 %v5931_v19, %v3437_v21  ;;  %v3510_v53 = vmul.f32 %v5931_v19, %v3438_v20  ;;  %v3511_v42 = vmul.f32 %v5931_v19, %v3439_v59 }
 0x652   :  { %v3531_v5 = vrot.slane %v3530_v49, 2  ;;  %v3537_v15 = vrot.slane %v3536_v57, 2  ;;  %v3543_v41 = vrot.slane %v3542_v34, 2  ;;  %v3548_v31 = vadd.f32 %v3547_v28, %v3500_v39 }
 0x653   :  { %v5950_v36 = vsel %vm3129_vm0, %v3893_v6, %v3889_v18  ;;  %v3512_v44 = vmul.f32 %v5931_v19, %v3440_v4  ;;  %v3601_v21 = vrot.slane %v3509_v40, 4  ;;  %v3607_v22 = vrot.slane %v3510_v53, 4 }
 0x654   :  { %6180 = vst [vmem:[#allocation9_spill] sm:$0xff] %v5950_v36  ;;  %v3532_v43 = vadd.f32 %v3531_v5, %v3530_v49  ;;  %v3538_v13 = vadd.f32 %v3537_v15, %v3536_v57  ;;  %v3544_v20 = vadd.f32 %v3543_v41, %v3542_v34  ;;  %v3549_v24 = vrot.slane %v3548_v31, 2 }
 0x655   :  { %v3602_v51 = vadd.f32 %v3601_v21, %v3509_v40  ;;  %v3608_v47 = vadd.f32 %v3607_v22, %v3510_v53  ;;  %v3613_v59 = vrot.slane %v3511_v42, 4  ;;  %v3619_v38 = vrot.slane %v3512_v44, 4  ;;  %v5955_v40 = vpop.permute.xlu0 %3479 }
 0x656   :  { %v3533_v7 = vrot.slane %v3532_v43, 1  ;;  %v3539_v52 = vrot.slane %v3538_v13, 1  ;;  %v3545_v39 = vrot.slane %v3544_v20, 1  ;;  %v3550_v61 = vadd.f32 %v3549_v24, %v3548_v31  ;;  %6181 = vst [vmem:[#allocation10_spill] sm:$0xff] %v5955_v40 }
 0x657   :  { %v3603_v6 = vrot.slane %v3602_v51, 2  ;;  %v3609_v50 = vrot.slane %v3608_v47, 2  ;;  %v3614_v28 = vadd.f32 %v3613_v59, %v3511_v42  ;;  %v3620_v16 = vadd.f32 %v3619_v38, %v3512_v44 }
 0x658   :  { %v3534_v18 = vadd.f32 %v3533_v7, %v3532_v43  ;;  %v3540_v4 = vadd.f32 %v3539_v52, %v3538_v13  ;;  %v3546_v2 = vadd.f32 %v3545_v39, %v3544_v20  ;;  %v3551_v27 = vrot.slane %v3550_v61, 1 }
 0x659   :  { %v3604_v49 = vadd.f32 %v3603_v6, %v3602_v51  ;;  %v3610_v57 = vadd.f32 %v3609_v50, %v3608_v47  ;;  %v3615_v34 = vrot.slane %v3614_v28, 2  ;;  %v3621_v5 = vrot.slane %v3620_v16, 2 }
 0x65a   :  { %v3552_v15 = vadd.f32 %v3551_v27, %v3550_v61  ;;  %v5959_v41 = vmul.f32 %v5877_v32, %v3534_v18  ;;  %v5962_v31 = vmul.f32 %v5880_v56, %v3540_v4  ;;  %v5965_v43 = vmul.f32 %v5883_v37, %v3546_v2 }
 0x65b   :  { %v3605_v42 = vrot.slane %v3604_v49, 1  ;;  %v3611_v44 = vrot.slane %v3610_v57, 1  ;;  %v3616_v21 = vadd.f32 %v3615_v34, %v3614_v28  ;;  %v3622_v22 = vadd.f32 %v3621_v5, %v3620_v16 }
 0x65c   :  { %v5968_v13 = vmul.f32 %v5886_v14, %v3552_v15  ;;  %v3513_v27 = vmul.f32 %v5955_v40, %v3441_v25  ;;  %v6182_v20 = vunpack.c.h.bf16 %v5612_v45  ;;  %v6183_v7 = vunpack.c.l.bf16 %v5723_v12 }
 0x65d   :  { %v3606_v51 = vadd.f32 %v3605_v42, %v3604_v49  ;;  %v3612_v47 = vadd.f32 %v3611_v44, %v3610_v57  ;;  %v3617_v59 = vrot.slane %v3616_v21, 1  ;;  %v3623_v38 = vrot.slane %v3622_v22, 1  ;;  %v5990_v57 = vpop.permute.xlu0 %3484 }
 0x65e   :  { %v3514_v24 = vmul.f32 %v5955_v40, %v6182_v20  ;;  %v3515_v2 = vmul.f32 %v5955_v40, %v6183_v7  ;;  %v6184_v52 = vunpack.c.h.bf16 %v5723_v12  ;;  %v3625_v61 = vrot.slane %v3513_v27, 4  ;;  %6185 = vst [vmem:[#allocation11_spill] sm:$0xff] %v5990_v57 }
 0x65f   :  { %v3618_v50 = vadd.f32 %v3617_v59, %v3616_v21  ;;  %v5983_v25 = vmul.f32 %v5877_v32, %v3606_v51  ;;  %v5986_v45 = vmul.f32 %v5880_v56, %v3612_v47  ;;  %v5992_v12 = vadd.f32 %v3623_v38, %v3622_v22 }
 0x660   :  { %v3516_v39 = vmul.f32 %v5955_v40, %v6184_v52  ;;  %v3631_v6 = vrot.slane %v3514_v24, 4  ;;  %v3626_v16 = vadd.f32 %v3625_v61, %v3513_v27  ;;  %v3637_v4 = vrot.slane %v3515_v2, 4 }
 0x661   :  { %v5995_v34 = vmul.f32 %v5883_v37, %v3618_v50  ;;  %v6187_v22 = vunpack.c.h.bf16 %v5618_v63  ;;  %v6188_v59 = vunpack.c.l.bf16 %v5725_v46 }
 0x662   :  { %v3632_v18 = vadd.f32 %v3631_v6, %v3514_v24  ;;  %v3643_v49 = vrot.slane %v3516_v39, 4  ;;  %v3627_v42 = vrot.slane %v3626_v16, 2  ;;  %v3638_v21 = vadd.f32 %v3637_v4, %v3515_v2 }
 0x663   :  { %v6186_v24 = vunpack.c.l.bf16 %v5618_v63  ;;  %v3518_v47 = vmul.f32 %v5990_v57, %v6187_v22  ;;  %v3519_v38 = vmul.f32 %v5990_v57, %v6188_v59 }
 0x664   :  { %v3633_v44 = vrot.slane %v3632_v18, 2  ;;  %v3644_v20 = vadd.f32 %v3643_v49, %v3516_v39  ;;  %v3628_v7 = vadd.f32 %v3627_v42, %v3626_v16  ;;  %v3639_v61 = vrot.slane %v3638_v21, 2 }
 0x665   :  { %v3517_v51 = vmul.f32 %v5990_v57, %v6186_v24  ;;  %v6189_v39 = vunpack.c.h.bf16 %v5725_v46  ;;  %v3655_v4 = vrot.slane %v3518_v47, 4  ;;  %v3661_v49 = vrot.slane %v3519_v38, 4 }
 0x666   :  { %v3634_v52 = vadd.f32 %v3633_v44, %v3632_v18  ;;  %v3645_v2 = vrot.slane %v3644_v20, 2  ;;  %v3629_v24 = vrot.slane %v3628_v7, 1  ;;  %v3640_v63 = vadd.f32 %v3639_v61, %v3638_v21  ;;  %v6013_v44 = vpop.permute.xlu0 %3489 }
 0x667   :  { %v3520_v6 = vmul.f32 %v5990_v57, %v6189_v39  ;;  %v3649_v50 = vrot.slane %v3517_v51, 4  ;;  %v3656_v53 = vadd.f32 %v3655_v4, %v3518_v47  ;;  %v3662_v1 = vadd.f32 %v3661_v49, %v3519_v38  ;;  %6190 = vst [vmem:[#allocation12_spill] sm:$0xff] %v6013_v44 }
 0x668   :  { %v3635_v27 = vrot.slane %v3634_v52, 1  ;;  %v3646_v28 = vadd.f32 %v3645_v2, %v3644_v20  ;;  %v3630_v59 = vadd.f32 %v3629_v24, %v3628_v7  ;;  %v3641_v18 = vrot.slane %v3640_v63, 1 }
 0x669   :  { %v3650_v22 = vadd.f32 %v3649_v50, %v3517_v51  ;;  %v3667_v30 = vrot.slane %v3520_v6, 4  ;;  %v3657_v15 = vrot.slane %v3656_v53, 2  ;;  %v3663_v39 = vrot.slane %v3662_v1, 2 }
 0x66a   :  { %v3636_v16 = vadd.f32 %v3635_v27, %v3634_v52  ;;  %v3647_v42 = vrot.slane %v3646_v28, 1  ;;  %v6016_v5 = vadd.f32 %v3641_v18, %v3640_v63  ;;  %v6019_v21 = vmul.f32 %v5877_v32, %v3630_v59  ;;  %v6040_v59 = vpop.permute.xlu0 %3494 }
 0x66b   :  { %v3651_v46 = vrot.slane %v3650_v22, 2  ;;  %v3668_v55 = vadd.f32 %v3667_v30, %v3520_v6  ;;  %v3658_v27 = vadd.f32 %v3657_v15, %v3656_v53  ;;  %v3664_v47 = vadd.f32 %v3663_v39, %v3662_v1  ;;  %6195 = vst [vmem:[#allocation13_spill] sm:$0xff] %v6040_v59 }
 0x66c   :  { %v6022_v20 = vmul.f32 %v5880_v56, %v3636_v16  ;;  %v6024_v7 = vadd.f32 %v3647_v42, %v3646_v28  ;;  %v6191_v61 = vunpack.c.l.bf16 %v5636_v11  ;;  %v6192_v24 = vunpack.c.h.bf16 %v5636_v11 }
 0x66d   :  { %v3652_v51 = vadd.f32 %v3651_v46, %v3650_v22  ;;  %v3669_v38 = vrot.slane %v3668_v55, 2  ;;  %v3659_v50 = vrot.slane %v3658_v27, 1  ;;  %v3665_v4 = vrot.slane %v3664_v47, 1 }
 0x66e   :  { %v3521_v2 = vmul.f32 %v6013_v44, %v6191_v61  ;;  %v3522_v53 = vmul.f32 %v6013_v44, %v6192_v24  ;;  %v6193_v1 = vunpack.c.l.bf16 %v5729_v58  ;;  %v6194_v15 = vunpack.c.h.bf16 %v5729_v58 }
 0x66f   :  { %v3653_v6 = vrot.slane %v3652_v51, 1  ;;  %v3670_v49 = vadd.f32 %v3669_v38, %v3668_v55  ;;  %v3660_v18 = vadd.f32 %v3659_v50, %v3658_v27  ;;  %v3666_v42 = vadd.f32 %v3665_v4, %v3664_v47 }
 0x670   :  { %v3523_v28 = vmul.f32 %v6013_v44, %v6193_v1  ;;  %v3524_v63 = vmul.f32 %v6013_v44, %v6194_v15  ;;  %v3673_v22 = vrot.slane %v3521_v2, 4  ;;  %v3679_v46 = vrot.slane %v3522_v53, 4 }
 0x671   :  { %v3654_v16 = vadd.f32 %v3653_v6, %v3652_v51  ;;  %v3671_v61 = vrot.slane %v3670_v49, 1  ;;  %v6196_v24 = vunpack.c.l.bf16 %v5638_v9  ;;  %v6197_v1 = vunpack.c.h.bf16 %v5638_v9 }
 0x672   :  { %v3674_v11 = vadd.f32 %v3673_v22, %v3521_v2  ;;  %v3685_v39 = vrot.slane %v3523_v28, 4  ;;  %v3691_v38 = vrot.slane %v3524_v63, 4  ;;  %v6198_v51 = vunpack.c.l.bf16 %v5731_v60 }
 0x673   :  { %v3525_v58 = vmul.f32 %v6040_v59, %v6196_v24  ;;  %v3526_v15 = vmul.f32 %v6040_v59, %v6197_v1  ;;  %v3680_v6 = vadd.f32 %v3679_v46, %v3522_v53  ;;  %v6199_v4 = vunpack.c.h.bf16 %v5731_v60 }
 0x674   :  { %v3527_v27 = vmul.f32 %v6040_v59, %v6198_v51  ;;  %v3675_v47 = vrot.slane %v3674_v11, 2  ;;  %v3686_v50 = vadd.f32 %v3685_v39, %v3523_v28  ;;  %v3692_v2 = vadd.f32 %v3691_v38, %v3524_v63 }
 0x675   :  { %v3528_v22 = vmul.f32 %v6040_v59, %v6199_v4  ;;  %v3697_v55 = vrot.slane %v3525_v58, 4  ;;  %v3703_v35 = vrot.slane %v3526_v15, 4  ;;  %v3681_v52 = vrot.slane %v3680_v6, 2 }
 0x676   :  { %v3709_v30 = vrot.slane %v3527_v27, 4  ;;  %v3676_v24 = vadd.f32 %v3675_v47, %v3674_v11  ;;  %v3687_v9 = vrot.slane %v3686_v50, 2  ;;  %v3693_v26 = vrot.slane %v3692_v2, 2 }
 0x677   :  { %v3698_v1 = vadd.f32 %v3697_v55, %v3525_v58  ;;  %v3704_v17 = vadd.f32 %v3703_v35, %v3526_v15  ;;  %v3715_v40 = vrot.slane %v3528_v22, 4  ;;  %v3682_v19 = vadd.f32 %v3681_v52, %v3680_v6 }
 0x678   :  { %v3710_v57 = vadd.f32 %v3709_v30, %v3527_v27  ;;  %v3677_v51 = vrot.slane %v3676_v24, 1  ;;  %v3688_v53 = vadd.f32 %v3687_v9, %v3686_v50  ;;  %v3694_v28 = vadd.f32 %v3693_v26, %v3692_v2 }
 0x679   :  { %v3699_v63 = vrot.slane %v3698_v1, 2  ;;  %v3705_v46 = vrot.slane %v3704_v17, 2  ;;  %v3716_v39 = vadd.f32 %v3715_v40, %v3528_v22  ;;  %v3683_v4 = vrot.slane %v3682_v19, 1 }
 0x67a   :  { %v3711_v60 = vrot.slane %v3710_v57, 2  ;;  %v3678_v38 = vadd.f32 %v3677_v51, %v3676_v24  ;;  %v3689_v59 = vrot.slane %v3688_v53, 1  ;;  %v3672_v62 = vadd.f32 %v3671_v61, %v3670_v49 }
 0x67b   :  { %v3700_v11 = vadd.f32 %v3699_v63, %v3698_v1  ;;  %v3706_v47 = vadd.f32 %v3705_v46, %v3704_v17  ;;  %v3717_v44 = vrot.slane %v3716_v39, 2  ;;  %v3684_v55 = vadd.f32 %v3683_v4, %v3682_v19 }
 0x67c   :  { %v3712_v36 = vadd.f32 %v3711_v60, %v3710_v57  ;;  %v3690_v35 = vadd.f32 %v3689_v59, %v3688_v53  ;;  %v3695_v30 = vrot.slane %v3694_v28, 1  ;;  %v6058_v52 = vmul.f32 %v5886_v14, %v5992_v12 }
 0x67d   :  { %v3701_v26 = vrot.slane %v3700_v11, 1  ;;  %v3707_v58 = vrot.slane %v3706_v47, 1  ;;  %v3718_v27 = vadd.f32 %v3717_v44, %v3716_v39  ;;  %v3761_v6 = vmul.f32 %v5883_v37, %v6016_v5 }
 0x67e   :  { %v3713_v15 = vrot.slane %v3712_v36, 1  ;;  %v3696_v40 = vadd.f32 %v3695_v30, %v3694_v28  ;;  %v3762_v17 = vmul.f32 %v5886_v14, %v6024_v7  ;;  %v3763_v57 = vmul.f32 %v5877_v32, %v3654_v16 }
 0x67f   :  { %v3702_v19 = vadd.f32 %v3701_v26, %v3700_v11  ;;  %v3708_v49 = vadd.f32 %v3707_v58, %v3706_v47  ;;  %v3719_v61 = vrot.slane %v3718_v27, 1  ;;  %v3764_v12 = vmul.f32 %v5880_v56, %v3660_v18 }
 0x680   :  { %v3714_v59 = vadd.f32 %v3713_v15, %v3712_v36  ;;  %v3765_v50 = vmul.f32 %v5883_v37, %v3666_v42  ;;  %v3766_v2 = vmul.f32 %v5886_v14, %v3672_v62  ;;  %v3767_v44 = vmul.f32 %v5877_v32, %v3678_v38 }
 0x681   :  { %v3720_v22 = vadd.f32 %v3719_v61, %v3718_v27  ;;  %v3768_v5 = vmul.f32 %v5880_v56, %v3684_v55  ;;  %v3769_v24 = vmul.f32 %v5883_v37, %v3690_v35  ;;  %v3770_v7 = vmul.f32 %v5886_v14, %v3696_v40 }
 0x682   :  { %v3771_v16 = vmul.f32 %v5877_v32, %v3702_v19  ;;  %v3772_v36 = vmul.f32 %v5880_v56, %v3708_v49  ;;  %v3773_v9 = vmul.f32 %v5883_v37, %v3714_v59  ;;  %v6200_v18 = vrot.slane %v5895_v8, 7 }
 0x683   :  { %v3774_v42 = vmul.f32 %v5886_v14, %v3720_v22  ;;  %v6201_v1 = vrot.slane %v5919_v10, 6  ;;  %v3815_v53 = vrot.slane %v3763_v57, 3  ;;  %v3817_v28 = vrot.slane %v3767_v44, 2 }
 0x684   :  { %v3808_v62 = vsel %vm3129_vm0, %v6200_v18, %v5959_v41  ;;  %v6202_v63 = vrot.slane %v5983_v25, 5  ;;  %v3819_v56 = vrot.slane %v3771_v16, 1  ;;  %v6203_v37 = vrot.slane %v5898_v54, 7 }
 0x685   :  { %v3810_v51 = vsel %vm3131_vm1, %v6201_v1, %v3808_v62  ;;  %v3829_v46 = vrot.slane %v3764_v12, 3  ;;  %v6204_v41 = vrot.slane %v6019_v21, 4  ;;  %v6205_v10 = vrot.slane %v5922_v48, 6 }
 0x686   :  { %v3812_v32 = vsel %vm3133_vm2, %v6202_v63, %v3810_v51  ;;  %v3822_v8 = vsel %vm3129_vm0, %v6203_v37, %v5962_v31  ;;  %v3831_v39 = vrot.slane %v3768_v5, 2  ;;  %v3833_v38 = vrot.slane %v3772_v36, 1  ;;  %v6214_v36 = vld [vmem:[#allocation9_spill] sm:$0xff]  ;;  %v6219_v51 = vld [vmem:[#allocation10_spill] sm:$0xff] }
 0x687   :  { %v3814_v14 = vsel %vm3135_vm3, %v6204_v41, %v3812_v32  ;;  %v3824_v60 = vsel %vm3131_vm1, %v6205_v10, %v3822_v8  ;;  %v6206_v4 = vrot.slane %v5986_v45, 5  ;;  %v6207_v54 = vrot.slane %v5901_v3, 7  ;;  %v6221_v32 = vld [vmem:[#allocation11_spill] sm:$0xff]  ;;  %v4317_v41 = vld [vmem:[#allocation3] ss:$0 sm:$0xff] }
 0x688   :  { %v3816_v25 = vsel %vm3137_vm4, %v3815_v53, %v3814_v14  ;;  %v3841_v21 = vrot.slane %v3761_v6, 4  ;;  %v6208_v48 = vrot.slane %v6022_v20, 4  ;;  %v6209_v35 = vrot.slane %v5925_v0, 6 }
 0x689   :  { %v3826_v11 = vsel %vm3133_vm2, %v6206_v4, %v3824_v60  ;;  %v3836_v31 = vsel %vm3129_vm0, %v6207_v54, %v5965_v43  ;;  %v3818_v47 = vsel %vm3139_vm5, %v3817_v28, %v3816_v25  ;;  %v3843_v26 = vrot.slane %v3765_v50, 3  ;;  %v6223_v4 = vld [vmem:[#allocation13_spill] sm:$0xff] }
 0x68a   :  { %v3828_v55 = vsel %vm3135_vm3, %v6208_v48, %v3826_v11  ;;  %v3838_v30 = vsel %vm3131_vm1, %v6209_v35, %v3836_v31  ;;  %v3820_v45 = vsel %vm3141_vm6, %v3819_v56, %v3818_v47  ;;  %v6210_v3 = vrot.slane %v5995_v34, 5 }
 0x68b   :  { %v3830_v58 = vsel %vm3137_vm4, %v3829_v46, %v3828_v55  ;;  %v3845_v15 = vrot.slane %v3769_v24, 2  ;;  %v3847_v40 = vrot.slane %v3773_v9, 1  ;;  %v6211_v0 = vrot.slane %v5904_v23, 7  ;;  %v6213_v24 = vld [vmem:[#allocation12_spill] sm:$0xff]  ;;  %v6215_v9 = vld [vmem:[#allocation7_spill] sm:$0xff] }
 0x68c   :  { %v3840_v43 = vsel %vm3133_vm2, %v6210_v3, %v3838_v30  ;;  %v3832_v27 = vsel %vm3139_vm5, %v3831_v39, %v3830_v58  ;;  %v6212_v49 = vrot.slane %v5934_v29, 6  ;;  %v3853_v59 = vrot.slane %v6058_v52, 5 }
 0x68d   :  { %v3842_v20 = vsel %vm3135_vm3, %v3841_v21, %v3840_v43  ;;  %v3850_v6 = vsel %vm3129_vm0, %v6211_v0, %v5968_v13  ;;  %v3834_v57 = vsel %vm3141_vm6, %v3833_v38, %v3832_v27  ;;  %v3855_v12 = vrot.slane %v3762_v17, 4 }
 0x68e   :  { %v3844_v19 = vsel %vm3137_vm4, %v3843_v26, %v3842_v20  ;;  %v3852_v34 = vsel %vm3131_vm1, %v6212_v49, %v3850_v6  ;;  %v3857_v50 = vrot.slane %v3766_v2, 3  ;;  %v3859_v44 = vrot.slane %v3770_v7, 2  ;;  %v6217_v7 = vld [vmem:[#allocation8_spill] sm:$0xff] }
 0x68f   :  { %v3846_v61 = vsel %vm3139_vm5, %v3845_v15, %v3844_v19  ;;  %v3854_v23 = vsel %vm3133_vm2, %v3853_v59, %v3852_v34  ;;  %v3861_v13 = vrot.slane %v3774_v42, 1  ;;  %v3867_v5 = vadd.f32 %v3834_v57, %v3820_v45 }
 0x690   :  { %v3848_v22 = vsel %vm3141_vm6, %v3847_v40, %v3846_v61  ;;  %v3913_v16 = vrot.slane %v6213_v24, %v5753_v33  ;;  %v3856_v29 = vsel %vm3135_vm3, %v3855_v12, %v3854_v23  ;;  %v6216_v52 = vrot.slane %v6215_v9, %v5753_v33 }
 0x691   :  { %v3858_v17 = vsel %vm3137_vm4, %v3857_v50, %v3856_v29  ;;  %v3868_v2 = vadd.f32 %v3867_v5, %v3848_v22  ;;  %v6218_v62 = vrot.slane %v6217_v7, %v5753_v33  ;;  %v6220_v53 = vrot.slane %v6219_v51, %v5753_v33 }
 0x692   :  { %v3919_v18 = vsel %vm3131_vm1, %v6216_v52, %v6214_v36  ;;  %v3860_v1 = vsel %vm3139_vm5, %v3859_v44, %v3858_v17  ;;  %v6222_v56 = vrot.slane %v6221_v32, %v5753_v33  ;;  %v3917_v11 = vrot.slane %v6223_v4, %v5753_v33 }
 0x693   :  { %v3920_v42 = vsel %vm3133_vm2, %v6218_v62, %v3919_v18  ;;  %v3862_v63 = vsel %vm3141_vm6, %v3861_v13, %v3860_v1 }
 0x694   :  { %v3921_v28 = vsel %vm3135_vm3, %v6220_v53, %v3920_v42  ;;  %v3869_v8 = vadd.f32 %v3868_v2, %v3862_v63 }
 0x695   :  { %v3922_v37 = vsel %vm3137_vm4, %v6222_v56, %v3921_v28 }
 0x696   :  { %v3923_v46 = vsel %vm3139_vm5, %v3913_v16, %v3922_v37  ;;  %3870 = vadd.xlane.f32.xlu0 %v3869_v8 }
 0x697   :  { %v3924_v31 = vsel %vm3141_vm6, %v3917_v11, %v3923_v46 }
 0x723   :  { %v3871_v14 = vpop.xlane.xlu0 %3870 }
 0x724   :  { %v3879_v10 = vadd.f32 %v4317_v41, %v3871_v14 }
 0x726   :  { %v4318_v60 = vmul.f32 -1.442695, %v3879_v10 }
 0x728   :  { %5062 = vpow2.f32 %v4318_v60 }
 0x732   :  { %v5063_v39 = vpop.eup %5062 }
 0x733   :  { %v3883_v38 = vadd.f32 1.0, %v5063_v39 }
 0x735   :  { %5064 = vrcp.f32 %v3883_v38 }
 0x73f   :  { %v5065_v25 = vpop.eup %5064 }
 0x740   :  { %3927 = vrot.lane.b32.xlu1 %v5065_v25, %s5094_s7 }
 0x7b2   :  { %v3928_v54 = vpop.permute.xlu1 %3927 }
 0x7b3   :  { %v3930_v21 = vsel %vm3144_vm7, %v3924_v31, %v3928_v54 }
 0x7b4   :  { %v3932_v47 = vsel %vm3931_vm8, %v3930_v21, 0.0 }
 0x7b5   :  { %3933 = vst [vmem:[%s6170_s9] sm:$0xff] %v3932_v47 }
 0x7b6   :  { %3938 = vsyncpa [#allocation5], 1 }

</bundles_post_ra>
